<compile_context>
chip_gen: v5e
topology: v5e:2x2
jax: 0.10.0
libtpu: 0.0.40
codegen_flags: <defaults>
</compile_context>

<pallas_src>
import jax
import jax.numpy as jnp
from jax.experimental import pallas as pl
from jax.experimental.pallas import tpu as pltpu

# BlendParams used by the FeatureShader / SoftSilhouetteShader paths in FootRenderer
SIGMA = 1e-4      # sil_blend_params / feat_blend_params sigma
GAMMA = 1e-4      # default BlendParams gamma
ZNEAR = 1.0       # softmax_blend default
ZFAR = 100.0      # softmax_blend default
EPS = 1e-10


def _softmax_blend_kernel(valid_ref, zbuf_ref, dists_ref, bary_ref, feat_ref,
                          img_ref, mask_ref):
    # Pixels on lanes, K on sublanes -> all K-reductions are sublane reduces.
    valid = valid_ref[...].astype(jnp.float32)          # (K, TP)
    zbuf = zbuf_ref[...]                                 # (K, TP) f32
    dists = dists_ref[...].astype(jnp.float32)           # (K, TP)

    prob = jax.nn.sigmoid(-dists / SIGMA) * valid         # (K, TP)   EUP sigmoid
    # alpha = prod_k (1 - prob)  ->  exp(sum(log(1 - prob))): full-width VALU/EUP
    # work instead of a K-long serial single-lane multiply chain.
    alpha = jnp.exp(jnp.sum(jnp.log(1.0 - prob), axis=0, keepdims=True))   # (1, TP)

    z_inv = (ZFAR - zbuf) / (ZFAR - ZNEAR) * valid         # (K, TP)
    z_inv_max = jnp.maximum(jnp.max(z_inv, axis=0, keepdims=True), EPS)    # (1, TP)
    weights = prob * jnp.exp((z_inv - z_inv_max) / GAMMA)                  # (K, TP)
    delta = jnp.maximum(jnp.exp((EPS - z_inv_max) / GAMMA), EPS)           # (1, TP)
    denom = jnp.sum(weights, axis=0, keepdims=True) + delta                # (1, TP)

    bary = bary_ref[...].astype(jnp.float32)               # (3, K, TP)
    feats = feat_ref[...].astype(jnp.float32)              # (3, C, K, TP) packed f0/f1/f2
    texels = (bary[0:1] * feats[0]
              + bary[1:2] * feats[1]
              + bary[2:3] * feats[2])                      # (C, K, TP)
    weighted = jnp.sum(weights[None, :, :] * texels, axis=1)               # (C, TP)

    # Background color is all-zeros on the FeatureShader path -> no background term.
    img_ref[...] = weighted / denom                        # (C, TP) lane-dense store
    mask_ref[...] = 1.0 - alpha                            # (1, TP) silhouette alpha


def softmax_blend_pallas(valid_t, zbuf_t, dists_t, bary_t, feats_t, *, tile=512):
    """Inputs in lane-dense (pixel-last) layout:
       valid/zbuf/dists: (K, P); bary: (3, K, P); feats: (3, C, K, P).
       Returns (features (P, C) f32, silhouette (P,) f32)."""
    K, P = valid_t.shape
    C = feats_t.shape[1]

    tile = max(128, (int(tile) // 128) * 128)      # lane-width multiple
    p_pad = pl.cdiv(P, tile) * tile                # pad instead of asserting divisibility
    pad = p_pad - P
    if pad:
        pad2 = ((0, 0), (0, pad))
        valid_t = jnp.pad(valid_t, pad2)           # padded pixels: valid=0 -> mask=0, feat=0
        zbuf_t = jnp.pad(zbuf_t, pad2)
        dists_t = jnp.pad(dists_t, pad2)
        bary_t = jnp.pad(bary_t, ((0, 0), (0, 0), (0, pad)))
        feats_t = jnp.pad(feats_t, ((0, 0), (0, 0), (0, 0), (0, pad)))

    # Scoped-VMEM request sized from the double-buffered per-step footprint,
    # capped so it stays inside v7x's 64 MiB per-TensorCore VMEM.
    step_bytes = tile * (2 * K + 4 * K + 2 * K + 3 * 2 * K + 3 * C * 2 * K + 4 * C + 4)
    vmem_limit = int(min(64 * 2 ** 20, max(32 * 2 ** 20, 4 * step_bytes)))

    grid = (p_pad // tile,)
    img_t, mask_t = pl.pallas_call(
        _softmax_blend_kernel,
        out_shape=(jax.ShapeDtypeStruct((C, p_pad), jnp.float32),
                   jax.ShapeDtypeStruct((1, p_pad), jnp.float32)),
        grid_spec=pltpu.PrefetchScalarGridSpec(
            num_scalar_prefetch=0,
            grid=grid,
            in_specs=[
                pl.BlockSpec((K, tile), lambda i: (0, i)),              # valid (bf16)
                pl.BlockSpec((K, tile), lambda i: (0, i)),              # zbuf  (f32)
                pl.BlockSpec((K, tile), lambda i: (0, i)),              # dists (bf16)
                pl.BlockSpec((3, K, tile), lambda i: (0, 0, i)),        # bary  (bf16)
                pl.BlockSpec((3, C, K, tile), lambda i: (0, 0, 0, i)),  # packed feats (bf16)
            ],
            out_specs=[
                pl.BlockSpec((C, tile), lambda i: (0, i)),              # features
                pl.BlockSpec((1, tile), lambda i: (0, i)),              # silhouette
            ],
        ),
        compiler_params=pltpu.CompilerParams(
            dimension_semantics=("parallel",),
            vmem_limit_bytes=vmem_limit),
    )(valid_t, zbuf_t, dists_t, bary_t, feats_t)

    return img_t[:, :P].T, mask_t[0, :P]


def foot_renderer_forward(verts_features, faces, pix_to_face, zbuf, dists, bary_coords,
                          num_meshes, num_views, image_size, *, tile=512):
    """FootRenderer.forward(..., return_features=True, return_mask=True, return_depth=True)

    fragments are the outputs of pytorch3d's rasterize_meshes.
    # TODO(synk): MeshRasterizer/rasterize_meshes, SoftPhongShader (Phong-lit image
    # path), PointsRenderer (keypoints), mask_out_faces and the camera/view helpers
    # are external pytorch3d components with no clean Pallas equivalent; only the
    # softmax_blend / FeatureShader / silhouette hot path runs in the Pallas kernel.
    """
    N, H, W, K = pix_to_face.shape
    C = verts_features.shape[-1]
    P = N * H * W

    # --- JAX glue: per-face per-vertex feature gather (TexturesVertex sampling),
    # replicated per view to match meshes.extend(num_views); done in bf16 to halve
    # HBM bytes of the single largest tensor.
    face_feats = verts_features[jnp.arange(num_meshes)[:, None, None], faces]     # (NM,F,3,C)
    face_feats = jnp.repeat(face_feats, num_views, axis=0).astype(jnp.bfloat16)   # (N,F,3,C)
    p2f_safe = jnp.maximum(pix_to_face, 0)
    feats_pix = jax.vmap(lambda ff, idx: ff[idx])(face_feats, p2f_safe)           # (N,H,W,K,3,C)

    # Lane-dense (pixel-last) packed layout for the kernel.
    feats_t = feats_pix.reshape(P, K, 3, C).transpose(2, 3, 1, 0)                 # (3,C,K,P) bf16
    bary_t = bary_coords.reshape(P, K, 3).transpose(2, 1, 0).astype(jnp.bfloat16) # (3,K,P)
    valid_t = (pix_to_face >= 0).reshape(P, K).T.astype(jnp.bfloat16)             # (K,P)
    dists_t = dists.reshape(P, K).T.astype(jnp.bfloat16)                          # (K,P)
    zbuf_t = zbuf.reshape(P, K).T.astype(jnp.float32)                             # (K,P) f32

    feat_img, sil = softmax_blend_pallas(valid_t, zbuf_t, dists_t, bary_t, feats_t,
                                         tile=tile)

    out = {}
    out['features'] = feat_img.reshape(num_meshes, num_views, H, W, C)
    out['mask'] = sil.reshape(num_meshes, num_views, H, W)
    out['depth'] = zbuf[..., 0].reshape(num_meshes, num_views, H, W)
    return out


# --- pure-JAX reference for correctness checking -------------------------------
def _softmax_blend_ref(p2f, zbuf, dists, bary, feats_pix, background):
    texels = jnp.einsum('nhwkv,nhwkvc->nhwkc', bary, feats_pix)
    mask = (p2f >= 0).astype(jnp.float32)
    prob = jax.nn.sigmoid(-dists / SIGMA) * mask
    alpha = jnp.prod(1.0 - prob, axis=-1)
    z_inv = (ZFAR - zbuf) / (ZFAR - ZNEAR) * mask
    z_inv_max = jnp.maximum(jnp.max(z_inv, axis=-1, keepdims=True), EPS)
    wn = prob * jnp.exp((z_inv - z_inv_max) / GAMMA)
    delta = jnp.maximum(jnp.exp((EPS - z_inv_max) / GAMMA), EPS)
    denom = wn.sum(-1, keepdims=True) + delta
    wc = (wn[..., None] * texels).sum(-2)
    wb = delta * background.reshape(1, 1, 1, -1)
    return (wc + wb) / denom, 1.0 - alpha


if __name__ == "__main__":
    key = jax.random.PRNGKey(0)
    num_meshes, num_views = 2, 2
    image_size = 16
    K = 8          # faces_per_pixel (sil rasterizer uses 100; small here)
    C = 4          # feature channels for return_features path
    V, F = 12, 20  # vertices / faces per mesh
    N = num_meshes * num_views
    H = W = image_size

    ks = jax.random.split(key, 6)
    verts_features = jax.random.normal(ks[0], (num_meshes, V, C), jnp.float32)
    faces = jax.random.randint(ks[1], (num_meshes, F, 3), 0, V)
    pix_to_face = jax.random.randint(ks[2], (N, H, W, K), -2, F)
    pix_to_face = jnp.where(pix_to_face < 0, -1, pix_to_face)
    zbuf = jax.random.uniform(ks[3], (N, H, W, K), jnp.float32, 0.1, 1.0)
    dists = jax.random.normal(ks[4], (N, H, W, K), jnp.float32) * 2e-4
    bary_coords = jax.nn.softmax(
        jax.random.normal(ks[5], (N, H, W, K, 3), jnp.float32), axis=-1)

    out = foot_renderer_forward(verts_features, faces, pix_to_face, zbuf, dists,
                                bary_coords, num_meshes, num_views, image_size)
    jax.block_until_ready(out)

    # reference check (same bf16 quantization of dists / bary / features as kernel path)
    face_feats = verts_features[jnp.arange(num_meshes)[:, None, None], faces]
    face_feats = jnp.repeat(face_feats, num_views, axis=0)
    feats_pix = jax.vmap(lambda ff, idx: ff[idx])(face_feats, jnp.maximum(pix_to_face, 0))
    feats_pix_q = feats_pix.astype(jnp.bfloat16).astype(jnp.float32)
    dists_q = dists.astype(jnp.bfloat16).astype(jnp.float32)
    bary_q = bary_coords.astype(jnp.bfloat16).astype(jnp.float32)

    ref_img, ref_mask = _softmax_blend_ref(pix_to_face, zbuf, dists_q, bary_q,
                                           feats_pix_q, jnp.zeros((C,), jnp.float32))
    ref_img = ref_img.reshape(num_meshes, num_views, H, W, C)
    ref_mask = ref_mask.reshape(num_meshes, num_views, H, W)

    assert jnp.allclose(out['features'], ref_img, atol=1e-3, rtol=1e-3), "features mismatch"
    assert jnp.allclose(out['mask'], ref_mask, atol=1e-3, rtol=1e-3), "mask mismatch"
    assert out['features'].shape == (num_meshes, num_views, H, W, C)
    assert out['mask'].shape == (num_meshes, num_views, H, W)
    assert out['depth'].shape == (num_meshes, num_views, H, W)

    print("KERNEL_OK")
</pallas_src>

<mosaic_0001>
module attributes {stable_mosaic.version = 11 : i64} {
  func.func @_softmax_blend_kernel(%arg0: i32, %arg1: memref<8x512xbf16, #tpu.memory_space<vmem>>, %arg2: memref<8x512xf32, #tpu.memory_space<vmem>>, %arg3: memref<8x512xbf16, #tpu.memory_space<vmem>>, %arg4: memref<3x8x512xbf16, #tpu.memory_space<vmem>>, %arg5: memref<3x4x8x512xbf16, #tpu.memory_space<vmem>>, %arg6: memref<4x512xf32, #tpu.memory_space<vmem>>, %arg7: memref<1x512xf32, #tpu.memory_space<vmem>>) attributes {dimension_semantics = [#tpu.dimension_semantics<parallel>], iteration_bounds = array<i64: 2>, scalar_prefetch = 0 : i64, scratch_operands = 0 : i64, tpu.core_type = #tpu.core_type<tc>, window_params = [{transform_indices = @transform_0, window_bounds = array<i64: 8, 512>}, {transform_indices = @transform_1, window_bounds = array<i64: 8, 512>}, {transform_indices = @transform_2, window_bounds = array<i64: 8, 512>}, {transform_indices = @transform_3, window_bounds = array<i64: 3, 8, 512>}, {transform_indices = @transform_4, window_bounds = array<i64: 3, 4, 8, 512>}, {transform_indices = @transform_5, window_bounds = array<i64: 4, 512>}, {transform_indices = @transform_6, window_bounds = array<i64: 1, 512>}]} {
    %c0 = arith.constant 0 : index
    %c0_0 = arith.constant 0 : index
    %0 = vector.load %arg1[%c0, %c0_0] : memref<8x512xbf16, #tpu.memory_space<vmem>>, vector<8x512xbf16>
    %1 = arith.extf %0 : vector<8x512xbf16> to vector<8x512xf32>
    %c0_1 = arith.constant 0 : index
    %c0_2 = arith.constant 0 : index
    %2 = vector.load %arg2[%c0_1, %c0_2] : memref<8x512xf32, #tpu.memory_space<vmem>>, vector<8x512xf32>
    %c0_3 = arith.constant 0 : index
    %c0_4 = arith.constant 0 : index
    %3 = vector.load %arg3[%c0_3, %c0_4] : memref<8x512xbf16, #tpu.memory_space<vmem>>, vector<8x512xbf16>
    %4 = arith.extf %3 : vector<8x512xbf16> to vector<8x512xf32>
    %cst = arith.constant 0.000000e+00 : f32
    %5 = vector.broadcast %cst : f32 to vector<8x512xf32>
    %6 = arith.subf %5, %4 : vector<8x512xf32>
    %cst_5 = arith.constant 9.99999974E-5 : f32
    %7 = vector.broadcast %cst_5 : f32 to vector<8x512xf32>
    %8 = arith.divf %6, %7 : vector<8x512xf32>
    %9 = arith.negf %8 : vector<8x512xf32>
    %10 = math.exp %9 : vector<8x512xf32>
    %cst_6 = arith.constant 1.000000e+00 : f32
    %11 = vector.broadcast %cst_6 : f32 to vector<8x512xf32>
    %12 = arith.addf %11, %10 : vector<8x512xf32>
    %13 = arith.divf %11, %12 : vector<8x512xf32>
    %14 = arith.mulf %13, %1 : vector<8x512xf32>
    %cst_7 = arith.constant 1.000000e+00 : f32
    %15 = vector.broadcast %cst_7 : f32 to vector<8x512xf32>
    %16 = arith.subf %15, %14 : vector<8x512xf32>
    %17 = math.log %16 : vector<8x512xf32>
    %cst_8 = arith.constant dense<0.000000e+00> : vector<512xf32>
    %18 = vector.multi_reduction <add>, %17, %cst_8 [0] : vector<8x512xf32> to vector<512xf32>
    %19 = vector.shape_cast %18 : vector<512xf32> to vector<1x512xf32>
    %20 = math.exp %19 : vector<1x512xf32>
    %cst_9 = arith.constant 1.000000e+02 : f32
    %21 = vector.broadcast %cst_9 : f32 to vector<8x512xf32>
    %22 = arith.subf %21, %2 : vector<8x512xf32>
    %cst_10 = arith.constant 9.900000e+01 : f32
    %23 = vector.broadcast %cst_10 : f32 to vector<8x512xf32>
    %24 = arith.divf %22, %23 : vector<8x512xf32>
    %25 = arith.mulf %24, %1 : vector<8x512xf32>
    %cst_11 = arith.constant dense<0xFF800000> : vector<512xf32>
    %26 = vector.multi_reduction <maximumf>, %25, %cst_11 [0] : vector<8x512xf32> to vector<512xf32>
    %27 = vector.shape_cast %26 : vector<512xf32> to vector<1x512xf32>
    %cst_12 = arith.constant 1.000000e-10 : f32
    %28 = vector.broadcast %cst_12 : f32 to vector<1x512xf32>
    %29 = arith.maximumf %27, %28 : vector<1x512xf32>
    %30 = vector.broadcast %29 : vector<1x512xf32> to vector<8x512xf32>
    %31 = arith.subf %25, %30 : vector<8x512xf32>
    %cst_13 = arith.constant 9.99999974E-5 : f32
    %32 = vector.broadcast %cst_13 : f32 to vector<8x512xf32>
    %33 = arith.divf %31, %32 : vector<8x512xf32>
    %34 = math.exp %33 : vector<8x512xf32>
    %35 = arith.mulf %14, %34 : vector<8x512xf32>
    %cst_14 = arith.constant 1.000000e-10 : f32
    %36 = vector.broadcast %cst_14 : f32 to vector<1x512xf32>
    %37 = arith.subf %36, %29 : vector<1x512xf32>
    %cst_15 = arith.constant 9.99999974E-5 : f32
    %38 = vector.broadcast %cst_15 : f32 to vector<1x512xf32>
    %39 = arith.divf %37, %38 : vector<1x512xf32>
    %40 = math.exp %39 : vector<1x512xf32>
    %cst_16 = arith.constant 1.000000e-10 : f32
    %41 = vector.broadcast %cst_16 : f32 to vector<1x512xf32>
    %42 = arith.maximumf %40, %41 : vector<1x512xf32>
    %cst_17 = arith.constant dense<0.000000e+00> : vector<512xf32>
    %43 = vector.multi_reduction <add>, %35, %cst_17 [0] : vector<8x512xf32> to vector<512xf32>
    %44 = vector.shape_cast %43 : vector<512xf32> to vector<1x512xf32>
    %45 = arith.addf %44, %42 : vector<1x512xf32>
    %c0_18 = arith.constant 0 : index
    %c0_19 = arith.constant 0 : index
    %c0_20 = arith.constant 0 : index
    %46 = vector.load %arg4[%c0_18, %c0_19, %c0_20] : memref<3x8x512xbf16, #tpu.memory_space<vmem>>, vector<3x8x512xbf16>
    %47 = arith.extf %46 : vector<3x8x512xbf16> to vector<3x8x512xf32>
    %c0_21 = arith.constant 0 : index
    %c0_22 = arith.constant 0 : index
    %c0_23 = arith.constant 0 : index
    %c0_24 = arith.constant 0 : index
    %48 = vector.load %arg5[%c0_21, %c0_22, %c0_23, %c0_24] : memref<3x4x8x512xbf16, #tpu.memory_space<vmem>>, vector<3x4x8x512xbf16>
    %49 = arith.extf %48 : vector<3x4x8x512xbf16> to vector<3x4x8x512xf32>
    %50 = vector.extract_strided_slice %47 {offsets = [0, 0, 0], sizes = [1, 8, 512], strides = [1, 1, 1]} : vector<3x8x512xf32> to vector<1x8x512xf32>
    %51 = vector.extract_strided_slice %49 {offsets = [0, 0, 0, 0], sizes = [1, 4, 8, 512], strides = [1, 1, 1, 1]} : vector<3x4x8x512xf32> to vector<1x4x8x512xf32>
    %52 = vector.shape_cast %51 : vector<1x4x8x512xf32> to vector<4x8x512xf32>
    %53 = vector.broadcast %50 : vector<1x8x512xf32> to vector<4x8x512xf32>
    %54 = arith.mulf %53, %52 : vector<4x8x512xf32>
    %55 = vector.extract_strided_slice %47 {offsets = [1, 0, 0], sizes = [1, 8, 512], strides = [1, 1, 1]} : vector<3x8x512xf32> to vector<1x8x512xf32>
    %56 = vector.extract_strided_slice %49 {offsets = [1, 0, 0, 0], sizes = [1, 4, 8, 512], strides = [1, 1, 1, 1]} : vector<3x4x8x512xf32> to vector<1x4x8x512xf32>
    %57 = vector.shape_cast %56 : vector<1x4x8x512xf32> to vector<4x8x512xf32>
    %58 = vector.broadcast %55 : vector<1x8x512xf32> to vector<4x8x512xf32>
    %59 = arith.mulf %58, %57 : vector<4x8x512xf32>
    %60 = arith.addf %54, %59 : vector<4x8x512xf32>
    %61 = vector.extract_strided_slice %47 {offsets = [2, 0, 0], sizes = [1, 8, 512], strides = [1, 1, 1]} : vector<3x8x512xf32> to vector<1x8x512xf32>
    %62 = vector.extract_strided_slice %49 {offsets = [2, 0, 0, 0], sizes = [1, 4, 8, 512], strides = [1, 1, 1, 1]} : vector<3x4x8x512xf32> to vector<1x4x8x512xf32>
    %63 = vector.shape_cast %62 : vector<1x4x8x512xf32> to vector<4x8x512xf32>
    %64 = vector.broadcast %61 : vector<1x8x512xf32> to vector<4x8x512xf32>
    %65 = arith.mulf %64, %63 : vector<4x8x512xf32>
    %66 = arith.addf %60, %65 : vector<4x8x512xf32>
    %67 = vector.shape_cast %35 : vector<8x512xf32> to vector<1x8x512xf32>
    %68 = vector.broadcast %67 : vector<1x8x512xf32> to vector<4x8x512xf32>
    %69 = arith.mulf %68, %66 : vector<4x8x512xf32>
    %cst_25 = arith.constant dense<0.000000e+00> : vector<4x512xf32>
    %70 = vector.multi_reduction <add>, %69, %cst_25 [1] : vector<4x8x512xf32> to vector<4x512xf32>
    %71 = vector.broadcast %45 : vector<1x512xf32> to vector<4x512xf32>
    %72 = arith.divf %70, %71 : vector<4x512xf32>
    %c0_26 = arith.constant 0 : index
    %c0_27 = arith.constant 0 : index
    %73 = vector.load %arg6[%c0_26, %c0_27] : memref<4x512xf32, #tpu.memory_space<vmem>>, vector<4x512xf32>
    tpu.vector_store %arg6[%c0_26, %c0_27], %72 {strides = array<i32>} : memref<4x512xf32, #tpu.memory_space<vmem>>, vector<4x512xf32>,
    %cst_28 = arith.constant 1.000000e+00 : f32
    %74 = vector.broadcast %cst_28 : f32 to vector<1x512xf32>
    %75 = arith.subf %74, %20 : vector<1x512xf32>
    %c0_29 = arith.constant 0 : index
    %c0_30 = arith.constant 0 : index
    %76 = vector.load %arg7[%c0_29, %c0_30] : memref<1x512xf32, #tpu.memory_space<vmem>>, vector<1x512xf32>
    tpu.vector_store %arg7[%c0_29, %c0_30], %75 {strides = array<i32>} : memref<1x512xf32, #tpu.memory_space<vmem>>, vector<1x512xf32>,
    return
  }
  func.func @transform_0(%arg0: i32) -> (i32, i32) {
    %c0_i32 = arith.constant 0 : i32
    %c0_i32_0 = arith.constant 0 : i32
    return %c0_i32, %arg0 : i32, i32
  }
  func.func @transform_1(%arg0: i32) -> (i32, i32) {
    %c0_i32 = arith.constant 0 : i32
    %c0_i32_0 = arith.constant 0 : i32
    return %c0_i32, %arg0 : i32, i32
  }
  func.func @transform_2(%arg0: i32) -> (i32, i32) {
    %c0_i32 = arith.constant 0 : i32
    %c0_i32_0 = arith.constant 0 : i32
    return %c0_i32, %arg0 : i32, i32
  }
  func.func @transform_3(%arg0: i32) -> (i32, i32, i32) {
    %c0_i32 = arith.constant 0 : i32
    %c0_i32_0 = arith.constant 0 : i32
    %c0_i32_1 = arith.constant 0 : i32
    return %c0_i32, %c0_i32_0, %arg0 : i32, i32, i32
  }
  func.func @transform_4(%arg0: i32) -> (i32, i32, i32, i32) {
    %c0_i32 = arith.constant 0 : i32
    %c0_i32_0 = arith.constant 0 : i32
    %c0_i32_1 = arith.constant 0 : i32
    %c0_i32_2 = arith.constant 0 : i32
    return %c0_i32, %c0_i32_0, %c0_i32_1, %arg0 : i32, i32, i32, i32
  }
  func.func @transform_5(%arg0: i32) -> (i32, i32) {
    %c0_i32 = arith.constant 0 : i32
    %c0_i32_0 = arith.constant 0 : i32
    return %c0_i32, %arg0 : i32, i32
  }
  func.func @transform_6(%arg0: i32) -> (i32, i32) {
    %c0_i32 = arith.constant 0 : i32
    %c0_i32_0 = arith.constant 0 : i32
    return %c0_i32, %arg0 : i32, i32
  }
}

</mosaic_0001>

<bundles_post_ra>
// kernel: tpu_custom_call.1
= control target key start
LH: loop header
LB: loop body
LE: loop exit
PB: predicated region body
PF: predicated region fallthrough
CT: control target
= control target key end

     0   :  { %s2710_s0 = inlined_call_operand.hbm [shape: bf16[8,1024], index: 0, kind: input, shape index: {}]   ;;  %s2711_s1 = inlined_call_operand.hbm [shape: f32[8,1024], index: 1, kind: input, shape index: {}]   ;;  %s2712_s2 = inlined_call_operand.hbm [shape: bf16[8,1024], index: 2, kind: input, shape index: {}]   ;;  %s2713_s3 = inlined_call_operand.hbm [shape: bf16[3,8,1024], index: 3, kind: input, shape index: {}]   ;;  %s2714_s4 = inlined_call_operand.hbm [shape: bf16[3,4,8,1024], index: 4, kind: input, shape index: {}]   ;;  %s2715_s5 = inlined_call_operand.hbm [shape: f32[4,1024], index: 5, kind: output, shape index: {0}]   ;;  %s2716_s6 = inlined_call_operand.hbm [shape: f32[1,1024], index: 6, kind: output, shape index: {1}]  }
   0x1   :  { %2746 = sst [smem:[#allocation41_spill]] %s2711_s1 }
   0x2   :  { %2747 = sst [smem:[#allocation42_spill]] %s2713_s3 }
   0x3   :  { %12 = vsyncpa [#allocation3], 0 }
   0x4   :  { %14 = vsyncpa [#allocation3 + $0x1], 0 }
   0x5   :  { %15 = vsyncpa [#allocation6], 0 }
   0x6   :  { %17 = vsyncpa [#allocation6 + $0x1], 0 }
   0x7   :  { %18 = vsyncpa [#allocation9], 0 }
   0x8   :  { %20 = vsyncpa [#allocation9 + $0x1], 0 }
   0x9   :  { %21 = vsyncpa [#allocation4], 0 }
   0xa   :  { %23 = vsyncpa [#allocation4 + $0x1], 0 }
   0xb   :  { %24 = vsyncpa [#allocation13], 0 }
   0xc   :  { %26 = vsyncpa [#allocation13 + $0x1], 0  ;;  %s1855_s21 = smov 0   ;;  %s1857_s22 = smov 0  }
   0xd   :  { %s1859_s23 = smov 0   ;;  %s1861_s24 = smov 0  }
   0xe LB: > { %2748 = sst [smem:[#allocation19_spill]] %s1801_s21  ;;  %s1876_s25 = sadd.s32 4294967295, %s1813_s24   ;;  %s1813_s24 = sphi %s1861_s24, %s2852_s24   ;;  %s1809_s23 = sphi %s1859_s23, %s2854_s23   ;;  %s1805_s22 = sphi %s1857_s22, %s2856_s22   ;;  %s1801_s21 = sphi %s1855_s21, %s2855_s21  }
   0xf   : > { %2749 = sst [smem:[#allocation20_spill]] %s1809_s23  ;;  %s1378_s26 = sadd.s32 4294967294, %s1813_s24  }
  0x10   : > { %2750 = sst [smem:[#allocation21_spill]] %s1813_s24  ;;  %s1880_s27 = sadd.s32 1, %s1813_s24  }
  0x11   : > { %2751 = sst [smem:[#allocation22_spill]] %s1880_s27  ;;  %s39_s28 = sadd.s32 1, %s1809_s23 }
  0x12   : > { %s36_s29 = ssub.s32 %s1813_s24, %s1880_s27  ;;  %p46_p0 = scmp.ne.s32.totalorder %s1809_s23, %s1805_s22 }
  0x13   : > { %p37_p1 = scmp.eq.s32.totalorder %s36_s29, 0  ;;  %p47_p2 = scmp.eq.s32.totalorder %s1813_s24, 0 }
  0x14   : > { %p52_p3 = scmp.ne.s32.totalorder %s1805_s22, %s1801_s21  ;;  %p53_p4 = scmp.eq.s32.totalorder %s1876_s25, 0 }
  0x15   : > { %s1892_s30 = scalar_select %p37_p1, %s1809_s23, %s39_s28  }
  0x16   : > { %p48_p5 = por %p47_p2, %p46_p0  ;;  %p1894_p6 = por %p53_p4, %p52_p3 }
  0x17   : > { %2752 = sst [smem:[#allocation23_spill]] %s1892_s30  ;;  %p180_p7 = scmp.eq.s32.totalorder %s1876_s25, 1 }
  0x18   : > { %p186_p8 = scmp.eq.s32.totalorder %s1378_s26, 1  ;;  %p1380_p9 = scmp.ge.s32.totalorder %s1813_s24, 2 }
  0x19   : > { %p1458_p10 = scmp.lt.s32.totalorder %s1813_s24, 2  ;;  %p1901_p11 = por %p180_p7, %p46_p0 }
  0x1a   : > { %p1905_p12 = por %p186_p8, %p52_p3  ;;  %s1910_s10 = sand.u32 1, %s1809_s23  }
  0x1b   : > { %s2754_s8 = scalar_select %p1901_p11, 1, 0 }
  0x1c   : > { %s2756_s9 = scalar_select %p1905_p12, 1, 0 }
  0x1d   : > { %2755 = sst [smem:[#allocation24_spill]] %s2754_s8  ;;  %p1912_p13 = pnand %p1458_p10, %p48_p5 }
  0x1e   : > { %2757 = sst [smem:[#allocation25_spill]] %s2756_s9  ;;  %s2717_s12 = sand.u32 1, %s1813_s24  }
  0x1f   : > { %s1384_s13 = sshll.u32 %s1910_s10, 5  ;;  %s1412_s14 = sshll.u32 %s1813_s24, 5 }
  0x20   : > { %s2759_s1 = sld [smem:[#allocation41_spill]]  ;;  %s256_s18 = scalar_lea.vmem [#allocation5], %s1384_s13 }
  0x21   : > { %s265_s19 = sshll.u32 %s256_s18, 4  ;;  %s1924_s26 = scalar_lea.sflag [#allocation6], %s2717_s12  ;;  %s266_s19 = int_to_ptr.vmem [resolvable:$true] %s265_s19 }
  0x22   : > { %p1928_p1 = pneg %p1912_p13 }
  0x26   : > { %s261_s17 = scalar_lea.hbm %s2759_s1, %s1412_s14  ;;  %s1564_s15 = scalar_lea.hbm %s2759_s1, 64 }
  0x27   : > { %s263_s20 = sshll.u32 %s261_s17, 4  ;;  %s264_s20 = int_to_ptr.hbm [resolvable:$true] %s263_s20 }
  0x28   : > { %s1557_s28 = sshra.s32 %s264_s20, 4  ;;  %s1558_s28 = int_to_ptr.hbm [resolvable:$true] %s1557_s28 }
  0x29   : > { %s1559_s29 = scalar_lea.hbm %s1558_s28, 32  ;;  %p1565_p4 = scmp.lt.s32.totalorder %s1558_s28, %s2759_s1 }
  0x2a   : > { %p1560_p0 = scmp.ne.s32.totalorder %s1558_s28, %s1559_s29  ;;  %p1566_p5 = scmp.lt.s32.totalorder %s1564_s15, %s1559_s29 }
  0x2c   : > { %p1562_p2 = pnand %p1928_p1, %p1560_p0  ;;  %p1567_p7 = por %p1566_p5, %p1565_p4 }
  0x2e   : > { %p1563_p3 = pneg %p1562_p2 }
  0x30   : > { %p1568_p8 = pnand %p1567_p7, %p1563_p3 }
  0x32   : > { %1571 = shalt.err (!%p1568_p8)
}
  0x33   : > { %1441 = dma.hbm_to_vmem [thread:$0]  (!%p1912_p13), %s264_s20, 512, %s266_s19, %s1924_s26  }
  0x34   : > { %p1394_p10 = scmp.ge.s32.totalorder %s1813_s24, 1  ;;  %p334_p0 = scmp.lt.s32.totalorder %s1813_s24, 3 }
  0x35   : > { %s1946_s18 = sshll.u32 %s1813_s24, 4  ;;  %s1417_s28 = smul.u32 48, %s1910_s10 }
  0x36   : > { %p1949_p2 = pnand %p1394_p10, %p334_p0  ;;  %s2762_s3 = sld [smem:[#allocation42_spill]] }
  0x37   : > { %s296_s17 = scalar_lea.vmem [#allocation8], %s1417_s28  ;;  %s2763_s19 = sand.u32 1, %s1813_s24  }
  0x38   : > { %s304_s12 = sshll.u32 %s296_s17, 4  ;;  %s1959_s20 = scalar_lea.sflag [#allocation9], %s2763_s19  ;;  %s305_s12 = int_to_ptr.vmem [resolvable:$true] %s304_s12 }
  0x3c   : > { %s301_s15 = scalar_lea.hbm %s2762_s3, %s1946_s18  ;;  %s1594_s13 = scalar_lea.hbm %s2762_s3, 96 }
  0x3d   : > { %s302_s16 = sshll.u32 %s301_s15, 4  ;;  %s303_s16 = int_to_ptr.hbm [resolvable:$true] %s302_s16 }
  0x3e   : > { %s1587_s1 = sshra.s32 %s303_s16, 4  ;;  %s1588_s1 = int_to_ptr.hbm [resolvable:$true] %s1587_s1 }
  0x3f   : > { %s1589_s23 = scalar_lea.hbm %s1588_s1, 48  ;;  %p1595_p7 = scmp.lt.s32.totalorder %s1588_s1, %s2762_s3 }
  0x40   : > { %p1590_p3 = scmp.ne.s32.totalorder %s1588_s1, %s1589_s23  ;;  %p1596_p8 = scmp.lt.s32.totalorder %s1594_s13, %s1589_s23 }
  0x42   : > { %p1592_p4 = pnand %p1590_p3, %p1928_p1  ;;  %p1597_p10 = por %p1596_p8, %p1595_p7 }
  0x44   : > { %p1593_p5 = pneg %p1592_p4 }
  0x46   : > { %p1598_p0 = pnand %p1597_p10, %p1593_p5 }
  0x48   : > { %1601 = shalt.err (!%p1598_p0)
}
  0x49   : > { %s2726_s28 = smov 512   ;;  %s2727_s17 = smov 256  }
  0x4a   : > { %s1817_s19 = smov 16   ;;  %s1381_s27 = sshll.u32 %s1910_s10, 4 }
  0x4b   : > { %1447 = dma.hbm_to_vmem [thread:$0]  (!%p1912_p13), %s303_s16, 768, %s305_s12, %s1959_s20, %s2726_s28, %s2727_s17, %s1817_s19  }
  0x4c   : > { %s241_s9 = scalar_lea.hbm %s2710_s0, %s1946_s18  ;;  %s236_s14 = scalar_lea.vmem [#allocation2], %s1381_s27 }
  0x4d   : > { %s243_s13 = sshll.u32 %s241_s9, 4  ;;  %s245_s15 = sshll.u32 %s236_s14, 4  ;;  %s244_s13 = int_to_ptr.hbm [resolvable:$true] %s243_s13  ;;  %s246_s15 = int_to_ptr.vmem [resolvable:$true] %s245_s15 }
  0x4e   : > { %s233_s3 = scalar_lea.sflag [#allocation3], %s1910_s10  ;;  %s1617_s24 = sshra.s32 %s244_s13, 4  ;;  %s1618_s24 = int_to_ptr.hbm [resolvable:$true] %s1617_s24 }
  0x4f   : > { %s1619_s21 = scalar_lea.hbm %s1618_s24, 16  ;;  %s1624_s16 = scalar_lea.hbm %s2710_s0, 32 }
  0x50   : > { %p1620_p3 = scmp.ne.s32.totalorder %s1618_s24, %s1619_s21  ;;  %p1625_p7 = scmp.lt.s32.totalorder %s1618_s24, %s2710_s0 }
  0x51   : > { %p1626_p8 = scmp.lt.s32.totalorder %s1624_s16, %s1619_s21 }
  0x52   : > { %p1622_p4 = pnand %p1620_p3, %p1928_p1 }
  0x53   : > { %p1627_p10 = por %p1626_p8, %p1625_p7 }
  0x54   : > { %p1623_p5 = pneg %p1622_p4 }
  0x56   : > { %p1628_p0 = pnand %p1627_p10, %p1623_p5 }
  0x58   : > { %1631 = shalt.err (!%p1628_p0)
}
  0x59   : > { %1438 = dma.hbm_to_vmem [thread:$0]  (!%p1912_p13), %s244_s13, 256, %s246_s15, %s233_s3  }
  0x5a   : > { %s281_s14 = scalar_lea.hbm %s2712_s2, %s1946_s18  ;;  %s276_s8 = scalar_lea.vmem [#allocation7], %s1381_s27 }
  0x5b   : > { %s283_s17 = sshll.u32 %s281_s14, 4  ;;  %s285_s12 = sshll.u32 %s276_s8, 4  ;;  %s284_s17 = int_to_ptr.hbm [resolvable:$true] %s283_s17  ;;  %s286_s12 = int_to_ptr.vmem [resolvable:$true] %s285_s12 }
  0x5c   : > { %s1647_s28 = sshra.s32 %s284_s17, 4  ;;  %s1654_s3 = scalar_lea.hbm %s2712_s2, 32  ;;  %s1648_s28 = int_to_ptr.hbm [resolvable:$true] %s1647_s28 }
  0x5d   : > { %s1649_s21 = scalar_lea.hbm %s1648_s28, 16  ;;  %p1655_p7 = scmp.lt.s32.totalorder %s1648_s28, %s2712_s2 }
  0x5e   : > { %p1650_p3 = scmp.ne.s32.totalorder %s1648_s28, %s1649_s21  ;;  %p1656_p8 = scmp.lt.s32.totalorder %s1654_s3, %s1649_s21 }
  0x60   : > { %p1652_p4 = pnand %p1650_p3, %p1928_p1  ;;  %p1657_p10 = por %p1656_p8, %p1655_p7 }
  0x62   : > { %p1653_p5 = pneg %p1652_p4 }
  0x64   : > { %p1658_p0 = pnand %p1657_p10, %p1653_p5 }
  0x66   : > { %1661 = shalt.err (!%p1658_p0)
}
  0x67   : > { %1444 = dma.hbm_to_vmem [thread:$0]  (!%p1912_p13), %s284_s17, 256, %s286_s12, %s1924_s26  }
  0x68   : > { %s1418_s27 = smul.u32 192, %s1910_s10  ;;  %s323_s9 = scalar_lea.hbm %s2714_s4, %s1946_s18 }
  0x69   : > { %s324_s14 = sshll.u32 %s323_s9, 4  ;;  %s1684_s10 = scalar_lea.hbm %s2714_s4, 384  ;;  %s325_s14 = int_to_ptr.hbm [resolvable:$true] %s324_s14 }
  0x6a   : > { %s318_s8 = scalar_lea.vmem [#allocation10], %s1418_s27  ;;  %s1677_s21 = sshra.s32 %s325_s14, 4  ;;  %s1678_s21 = int_to_ptr.hbm [resolvable:$true] %s1677_s21 }
  0x6b   : > { %s326_s28 = sshll.u32 %s318_s8, 4  ;;  %s1679_s24 = scalar_lea.hbm %s1678_s21, 192  ;;  %s327_s28 = int_to_ptr.vmem [resolvable:$true] %s326_s28 }
  0x6c   : > { %p1680_p3 = scmp.ne.s32.totalorder %s1678_s21, %s1679_s24  ;;  %p1685_p7 = scmp.lt.s32.totalorder %s1678_s21, %s2714_s4 }
  0x6d   : > { %p1686_p8 = scmp.lt.s32.totalorder %s1684_s10, %s1679_s24 }
  0x6e   : > { %p1682_p4 = pnand %p1680_p3, %p1928_p1 }
  0x6f   : > { %p1687_p10 = por %p1686_p8, %p1685_p7 }
  0x70   : > { %p1683_p5 = pneg %p1682_p4 }
  0x72   : > { %p1688_p0 = pnand %p1687_p10, %p1683_p5 }
  0x74   : > { %1691 = shalt.err (!%p1688_p0)
}
  0x75   : > { %s2764_s18 = smov 256   ;;  %s2765_s12 = smov 512  }
  0x76   : > { %1450 = dma.hbm_to_vmem [thread:$0]  (!%p1912_p13), %s325_s14, 3072, %s327_s28, %s1959_s20, %s2765_s12, %s2764_s18, %s1817_s19  }
  0x77   : > { %338 = sbr.rel (%p1949_p2) target bundleno = 318 (0x13e), region = 40 }
  0x7c   : > { %s2028_s30 = sand.u32 1, %s1805_s22  }
  0x7d   : > { %s2031_s13 = sshll.u32 %s2028_s30, 4  ;;  %s341_s15 = scalar_lea.sflag [#allocation3], %s2028_s30 }
  0x7e   : > { %s344_s27 = scalar_lea.vmem [#allocation2], %s2031_s13 }
  0x7f   : > { %1780 = dma.done.wait (%p1894_p6), %s341_s15, 256  }
  0x80   : > { %1782 = vsyncadd (%p1894_p6), %s341_s15, 4294967040  ;;  %s350_s11 = sand.u32 1, %s1876_s25   ;;  %s1396_s29 = sshll.u32 %s2028_s30, 5 }
  0x81   : > { %s351_s20 = scalar_lea.sflag [#allocation6], %s350_s11  ;;  %s354_s19 = scalar_lea.vmem [#allocation5], %s1396_s29 }
  0x82   : > { %1784 = dma.done.wait (%p1894_p6), %s351_s20, 768  }
  0x83   : > { %1786 = vsyncadd (%p1894_p6), %s351_s20, 4294966528  ;;  %s1419_s1 = smul.u32 48, %s2028_s30  ;;  %s364_s23 = scalar_lea.vmem [#allocation7], %s2031_s13 }
  0x84   : > { %s371_s9 = scalar_lea.sflag [#allocation9], %s350_s11 }
  0x85   : > { %s2047_s14 = scalar_lea.vmem [#allocation8], %s1419_s1 }
  0x86   : > { %1788 = dma.done.wait (%p1894_p6), %s371_s9, 3840  }
  0x87   : > { %1790 = vsyncadd (%p1894_p6), %s371_s9, 4294963456  ;;  %v1818_v0 = vmov 0.0001   ;;  %v1819_v1 = vmov 99.0   ;;  %v456_v4 = vld [vmem:[%s364_s23] sm:$0xff]  ;;  %v457_v5 = vld [vmem:[%s364_s23 + $0x8] sm:$0xff] }
  0x88   : > { %1497 = vrcp.f32 %v1818_v0  ;;  %v458_v7 = vunpack.c.l.bf16 %v456_v4  ;;  %v459_v8 = vunpack.c.h.bf16 %v456_v4  ;;  %v460_v9 = vunpack.c.l.bf16 %v457_v5  ;;  %v452_v13 = vld [vmem:[%s354_s19] sm:$0xff]  ;;  %v453_v14 = vld [vmem:[%s354_s19 + $0x8] sm:$0xff]  ;;  %v454_v17 = vld [vmem:[%s354_s19 + $0x10] sm:$0xff]  ;;  %s1420_s7 = smul.u32 192, %s2028_s30  ;;  %s1399_s28 = sshll.u32 %s2028_s30, 2 }
  0x89   : > { %1499 = vrcp.f32 %v1819_v1  ;;  %v461_v10 = vunpack.c.h.bf16 %v457_v5  ;;  %v455_v18 = vld [vmem:[%s354_s19 + $0x18] sm:$0xff]  ;;  %v2055_v23 = vld [vmem:[%s344_s27] sm:$0xff]  ;;  %v601_v28 = vsub.f32 100.0, %v452_v13  ;;  %v602_v29 = vsub.f32 100.0, %v453_v14  ;;  %s1408_s21 = sshll.u32 %s1876_s25, 2  ;;  %s1416_s10 = sshll.u32 %s1876_s25, 4 }
  0x8a   : > { %v462_v19 = vsub.f32 0.0, %v458_v7  ;;  %v463_v20 = vsub.f32 0.0, %v459_v8  ;;  %v464_v21 = vsub.f32 0.0, %v460_v9  ;;  %v2059_v26 = vld [vmem:[%s344_s27 + $0x8] sm:$0xff]  ;;  %v448_v27 = vunpack.c.l.bf16 %v2055_v23  ;;  %s2243_s8 = scalar_lea.vmem [#allocation10], %s1420_s7  ;;  %s2627_s3 = scalar_lea.hbm %s2716_s6, %s1408_s21 }
  0x8b   : > { %v465_v22 = vsub.f32 0.0, %v461_v10  ;;  %v603_v31 = vsub.f32 100.0, %v454_v17  ;;  %v604_v32 = vsub.f32 100.0, %v455_v18  ;;  %v449_v38 = vunpack.c.h.bf16 %v2055_v23  ;;  %s438_s26 = scalar_lea.vmem [#allocation12], %s1399_s28  ;;  %s1188_s18 = sshll.u32 %s2627_s3, 4  ;;  %s2650_s18 = int_to_ptr.hbm [resolvable:$true] %s1188_s18 }
  0x8c   : > { %v450_v39 = vunpack.c.l.bf16 %v2059_v26  ;;  %v451_v40 = vunpack.c.h.bf16 %v2059_v26  ;;  %s1186_s17 = sshll.u32 %s438_s26, 4  ;;  %s2646_s15 = scalar_lea.hbm %s2715_s5, %s1416_s10  ;;  %s2648_s17 = int_to_ptr.vmem [resolvable:$true] %s1186_s17 }
  0x8d   : > { %s431_s11 = scalar_lea.vmem [#allocation11], %s2031_s13  ;;  %s1174_s20 = sshll.u32 %s2646_s15, 4  ;;  %s1175_s20 = int_to_ptr.hbm [resolvable:$true] %s1174_s20 }
  0x8e   : > { %v1498_v2 = vpop.eup %1497  ;;  %s1172_s29 = sshll.u32 %s431_s11, 4  ;;  %s1159_s19 = scalar_lea.sflag [#allocation13], %s2028_s30  ;;  %s1173_s29 = int_to_ptr.vmem [resolvable:$true] %s1172_s29 }
  0x8f   : > { %v1500_v3 = vpop.eup %1499  ;;  %v467_v6 = vmul.f32 0.0001, %v1498_v2  ;;  %vm471_vm0 = vweird.f32 %v1498_v2  ;;  %s1721_s1 = sshra.s32 %s2650_s18, 4  ;;  %s1727_s7 = scalar_lea.hbm %s2716_s6, 8  ;;  %s1722_s1 = int_to_ptr.hbm [resolvable:$true] %s1721_s1 }
  0x90   : > { %v606_v12 = vmul.f32 99.0, %v1500_v3  ;;  %vm610_vm1 = vweird.f32 %v1500_v3  ;;  %s1723_s23 = scalar_lea.hbm %s1722_s1, 4  ;;  %p1728_p2 = scmp.lt.s32.totalorder %s1722_s1, %s2716_s6 }
  0x91   : > { %v468_v11 = vsub.f32 1.0, %v467_v6  ;;  %p1724_p6 = scmp.ne.s32.totalorder %s1722_s1, %s1723_s23  ;;  %p1729_p3 = scmp.lt.s32.totalorder %s1727_s7, %s1723_s23 }
  0x92   : > { %v607_v16 = vsub.f32 1.0, %v606_v12 }
  0x93   : > { %v469_v15 = vmul.f32 %v1498_v2, %v468_v11  ;;  %p1725_p13 = pnand %p1724_p6, %p1901_p11  ;;  %p1730_p4 = por %p1729_p3, %p1728_p2 }
  0x94   : > { %v608_v25 = vmul.f32 %v1500_v3, %v607_v16 }
  0x95   : > { %v470_v24 = vadd.f32 %v1498_v2, %v469_v15  ;;  %p1726_p1 = pneg %p1725_p13 }
  0x96   : > { %v609_v33 = vadd.f32 %v1500_v3, %v608_v25 }
  0x97   : > { %v2063_v30 = vsel %vm471_vm0, %v1498_v2, %v470_v24  ;;  %p1731_p5 = pnand %p1730_p4, %p1726_p1 }
  0x98   : > { %v473_v34 = vmul.f32 %v2063_v30, %v462_v19  ;;  %v474_v35 = vmul.f32 %v2063_v30, %v463_v20  ;;  %v475_v36 = vmul.f32 %v2063_v30, %v464_v21  ;;  %v476_v37 = vmul.f32 %v2063_v30, %v465_v22 }
  0x99   : > { %v611_v41 = vsel %vm610_vm1, %v1500_v3, %v609_v33 }
  0x9a   : > { %v1400_v42 = vmul.f32 -1.442695, %v473_v34  ;;  %v1401_v43 = vmul.f32 -1.442695, %v474_v35  ;;  %v1402_v44 = vmul.f32 -1.442695, %v475_v36  ;;  %v612_v45 = vmul.f32 %v611_v41, %v601_v28 }
  0x9b   : > { %v1403_v46 = vmul.f32 -1.442695, %v476_v37  ;;  %v613_v47 = vmul.f32 %v611_v41, %v602_v29  ;;  %v614_v48 = vmul.f32 %v611_v41, %v603_v31  ;;  %v615_v49 = vmul.f32 %v611_v41, %v604_v32 }
  0x9c   : > { %1501 = vpow2.f32 %v1400_v42  ;;  %v2074_v50 = vmul.f32 %v612_v45, %v448_v27 }
  0x9d   : > { %1503 = vpow2.f32 %v1401_v43  ;;  %v2078_v51 = vmul.f32 %v613_v47, %v449_v38  ;;  %v2082_v52 = vmul.f32 %v614_v48, %v450_v39  ;;  %v2086_v53 = vmul.f32 %v615_v49, %v451_v40 }
  0x9e   : > { %1505 = vpow2.f32 %v1402_v44  ;;  %v620_v54 = vrot.slane %v2074_v50, 4 }
  0x9f   : > { %1507 = vpow2.f32 %v1403_v46  ;;  %v626_v55 = vrot.slane %v2078_v51, 4  ;;  %v632_v56 = vrot.slane %v2082_v52, 4  ;;  %v638_v57 = vrot.slane %v2086_v53, 4 }
  0xa0   : > { %v621_v58 = vmax.f32 %v2074_v50, %v620_v54 }
  0xa1   : > { %v627_v59 = vmax.f32 %v2078_v51, %v626_v55  ;;  %v633_v60 = vmax.f32 %v2082_v52, %v632_v56  ;;  %v639_v61 = vmax.f32 %v2086_v53, %v638_v57 }
  0xa2   : > { %v1502_v62 = vpop.eup %1501  ;;  %v622_v1 = vrot.slane %v621_v58, 2 }
  0xa3   : > { %v1504_v63 = vpop.eup %1503  ;;  %v489_v0 = vadd.f32 1.0, %v1502_v62  ;;  %v628_v4 = vrot.slane %v627_v59, 2  ;;  %v634_v7 = vrot.slane %v633_v60, 2  ;;  %v640_v8 = vrot.slane %v639_v61, 2 }
  0xa4   : > { %v1506_v2 = vpop.eup %1505  ;;  %v2096_v3 = vadd.f32 1.0, %v1504_v63  ;;  %v623_v14 = vmax.f32 %v621_v58, %v622_v1 }
  0xa5   : > { %v1508_v5 = vpop.eup %1507  ;;  %v2098_v6 = vadd.f32 1.0, %v1506_v2  ;;  %1509 = vrcp.f32 %v489_v0  ;;  %v502_v10 = vand.u32 2147483647, %v489_v0  ;;  %v504_v11 = vand.u32 2147483648, %v489_v0 }
  0xa6   : > { %v2100_v9 = vadd.f32 1.0, %v1508_v5  ;;  %1511 = vrcp.f32 %v2096_v3  ;;  %v517_v12 = vand.u32 2147483647, %v2096_v3  ;;  %v519_v13 = vand.u32 2147483648, %v2096_v3 }
  0xa7   : > { %1513 = vrcp.f32 %v2098_v6  ;;  %vm498_vm2 = vweird.f32 %v489_v0  ;;  %v532_v15 = vand.u32 2147483647, %v2098_v6  ;;  %v534_v16 = vand.u32 2147483648, %v2098_v6 }
  0xa8   : > { %v505_v17 = vor.u32 1.1754944e-38, %v504_v11  ;;  %vm513_vm3 = vweird.f32 %v2096_v3  ;;  %vm528_vm4 = vweird.f32 %v2098_v6  ;;  %1515 = vrcp.f32 %v2100_v9 }
  0xa9   : > { %vm2111_vm5 = vcmp.eq.f32.partialorder %v502_v10, 8.507059e+37  ;;  %v520_v19 = vor.u32 1.1754944e-38, %v519_v13  ;;  %vm543_vm6 = vweird.f32 %v2100_v9  ;;  %v547_v20 = vand.u32 2147483647, %v2100_v9 }
  0xaa   : > { %v549_v21 = vand.u32 2147483648, %v2100_v9  ;;  %vm2118_vm7 = vcmp.eq.f32.partialorder %v517_v12, 8.507059e+37  ;;  %v624_v25 = vrot.slane %v623_v14, 1  ;;  %v629_v28 = vmax.f32 %v627_v59, %v628_v4 }
  0xab   : > { %v1510_v22 = vpop.eup %1509  ;;  %v635_v29 = vmax.f32 %v633_v60, %v634_v7  ;;  %v641_v31 = vmax.f32 %v639_v61, %v640_v8  ;;  %vm2122_vm9 = vcmp.eq.f32.partialorder %v532_v15, 8.507059e+37  ;;  %v535_v35 = vor.u32 1.1754944e-38, %v534_v16 }
  0xac   : > { %v1512_v32 = vpop.eup %1511  ;;  %v494_v33 = vmul.f32 %v1510_v22, %v489_v0  ;;  %vm499_vm8 = vweird.f32 %v1510_v22  ;;  %v550_v36 = vor.u32 1.1754944e-38, %v549_v21  ;;  %v625_v42 = vmax.f32 %v623_v14, %v624_v25 }
  0xad   : > { %v1514_v37 = vpop.eup %1513  ;;  %v509_v41 = vmul.f32 %v1512_v32, %v2096_v3  ;;  %vm514_vm10 = vweird.f32 %v1512_v32  ;;  %v630_v43 = vrot.slane %v629_v28, 1  ;;  %vm2128_vm12 = vcmp.eq.f32.partialorder %v547_v20, 8.507059e+37  ;;  %vm2135_vm14 = vmor %vm498_vm2, %vm499_vm8 }
  0xae   : > { %v495_v44 = vsub.f32 1.0, %v494_v33  ;;  %v524_v45 = vmul.f32 %v1514_v37, %v2098_v6  ;;  %vm529_vm11 = vweird.f32 %v1514_v37  ;;  %v636_v47 = vrot.slane %v635_v29, 1  ;;  %v1516_v48 = vpop.eup %1515  ;;  %vm2142_vm15 = vmor %vm513_vm3, %vm514_vm10 }
  0xaf   : > { %v510_v49 = vsub.f32 1.0, %v509_v41  ;;  %v631_v54 = vmax.f32 %v629_v28, %v630_v43  ;;  %v642_v55 = vrot.slane %v641_v31, 1  ;;  %v644_v56 = vmax.f32 %v625_v42, 1e-10  ;;  %vm2150_vm0 = vmor %vm528_vm4, %vm529_vm11 }
  0xb0   : > { %v496_v57 = vmul.f32 %v1510_v22, %v495_v44  ;;  %v525_v58 = vsub.f32 1.0, %v524_v45  ;;  %v539_v59 = vmul.f32 %v1516_v48, %v2100_v9  ;;  %vm544_vm13 = vweird.f32 %v1516_v48  ;;  %v716_v45 = vld [vmem:[%s2047_s14] sm:$0xff] }
  0xb1   : > { %v511_v61 = vmul.f32 %v1512_v32, %v510_v49  ;;  %v637_v62 = vmax.f32 %v635_v29, %v636_v47  ;;  %v643_v63 = vmax.f32 %v641_v31, %v642_v55  ;;  %v645_v1 = vmax.f32 %v631_v54, 1e-10  ;;  %vm545_vm1 = vmor %vm543_vm6, %vm544_vm13  ;;  %v717_v54 = vld [vmem:[%s2047_s14 + $0x8] sm:$0xff]  ;;  %v718_v55 = vld [vmem:[%s2047_s14 + $0x10] sm:$0xff] }
  0xb2   : > { %v497_v2 = vadd.f32 %v1510_v22, %v496_v57  ;;  %v526_v5 = vmul.f32 %v1514_v37, %v525_v58  ;;  %v540_v7 = vsub.f32 1.0, %v539_v59  ;;  %v648_v0 = vsub.f32 %v2074_v50, %v644_v56 }
  0xb3   : > { %v512_v8 = vadd.f32 %v1512_v32, %v511_v61  ;;  %v646_v11 = vmax.f32 %v637_v62, 1e-10  ;;  %v647_v12 = vmax.f32 %v643_v63, 1e-10  ;;  %v649_v3 = vsub.f32 %v2078_v51, %v645_v1 }
  0xb4   : > { %v501_v13 = vsel %vm2135_vm14, %v1510_v22, %v497_v2  ;;  %v527_v14 = vadd.f32 %v1514_v37, %v526_v5  ;;  %v541_v15 = vmul.f32 %v1516_v48, %v540_v7  ;;  %v652_v16 = vmul.f32 %v648_v0, %v2063_v30 }
  0xb5   : > { %v506_v50 = vsel %vm2111_vm5, %v505_v17, %v501_v13  ;;  %v516_v6 = vsel %vm2142_vm15, %v1512_v32, %v512_v8  ;;  %v650_v20 = vsub.f32 %v2082_v52, %v646_v11  ;;  %v651_v51 = vsub.f32 %v2086_v53, %v647_v12 }
  0xb6   : > { %v521_v21 = vsel %vm2118_vm7, %v520_v19, %v516_v6  ;;  %v531_v22 = vsel %vm2150_vm0, %v1514_v37, %v527_v14  ;;  %v542_v25 = vadd.f32 %v1516_v48, %v541_v15  ;;  %v553_v17 = vmul.f32 %v506_v50, %v448_v27  ;;  %v719_v6 = vld [vmem:[%s2047_s14 + $0x18] sm:$0xff] }
  0xb7   : > { %v536_v18 = vsel %vm2122_vm9, %v535_v35, %v531_v22  ;;  %v554_v9 = vmul.f32 %v521_v21, %v449_v38  ;;  %v653_v52 = vmul.f32 %v649_v3, %v2063_v30  ;;  %v654_v53 = vmul.f32 %v650_v20, %v2063_v30 }
  0xb8   : > { %v546_v28 = vsel %vm545_vm1, %v1516_v48, %v542_v25  ;;  %v2181_v19 = vmul.f32 %v536_v18, %v450_v39  ;;  %v557_v24 = vsub.f32 1.0, %v553_v17  ;;  %v655_v31 = vmul.f32 %v651_v51, %v2063_v30 }
  0xb9   : > { %v551_v29 = vsel %vm2128_vm12, %v550_v36, %v546_v28  ;;  %v558_v27 = vsub.f32 1.0, %v554_v9  ;;  %v656_v32 = vmul.f32 1.442695, %v652_v16  ;;  %v658_v33 = vmul.f32 1.442695, %v653_v52 }
  0xba   : > { %v2188_v23 = vmul.f32 %v551_v29, %v451_v40  ;;  %v559_v38 = vsub.f32 1.0, %v2181_v19  ;;  %1517 = vlog2.f32 %v557_v24  ;;  %v660_v39 = vmul.f32 1.442695, %v654_v53 }
  0xbb   : > { %1519 = vlog2.f32 %v558_v27  ;;  %v668_v34 = vsub.f32 1e-10, %v644_v56  ;;  %v669_v35 = vsub.f32 1e-10, %v645_v1  ;;  %v670_v36 = vsub.f32 1e-10, %v646_v11 }
  0xbc   : > { %v560_v37 = vsub.f32 1.0, %v2188_v23  ;;  %1521 = vlog2.f32 %v559_v38  ;;  %v671_v41 = vsub.f32 1e-10, %v647_v12  ;;  %v662_v26 = vmul.f32 1.442695, %v655_v31 }
  0xbd   : > { %1523 = vpow2.f32 %v656_v32  ;;  %v672_v40 = vmul.f32 %v668_v34, %v2063_v30  ;;  %v673_v42 = vmul.f32 %v669_v35, %v2063_v30  ;;  %v674_v43 = vmul.f32 %v670_v36, %v2063_v30 }
  0xbe   : > { %1525 = vlog2.f32 %v560_v37  ;;  %v675_v44 = vmul.f32 %v671_v41, %v2063_v30  ;;  %v2199_v56 = vunpack.c.l.bf16 %v716_v45  ;;  %v2201_v61 = vunpack.c.h.bf16 %v716_v45 }
  0xbf   : > { %1527 = vpow2.f32 %v658_v33  ;;  %v676_v49 = vmul.f32 1.442695, %v672_v40  ;;  %v678_v59 = vmul.f32 1.442695, %v673_v42  ;;  %v680_v60 = vmul.f32 1.442695, %v674_v43 }
  0xc0   : > { %v1518_v46 = vpop.eup %1517  ;;  %1529 = vpow2.f32 %v660_v39  ;;  %v682_v1 = vmul.f32 1.442695, %v675_v44  ;;  %v2203_v2 = vunpack.c.l.bf16 %v717_v54  ;;  %v2207_v0 = vunpack.c.h.bf16 %v717_v54 }
  0xc1   : > { %v1520_v47 = vpop.eup %1519  ;;  %v562_v48 = vmul.f32 0.6931472, %v1518_v46  ;;  %1531 = vpow2.f32 %v662_v26  ;;  %v2209_v8 = vunpack.c.l.bf16 %v718_v55  ;;  %v2211_v13 = vunpack.c.h.bf16 %v718_v55 }
  0xc2   : > { %v1522_v57 = vpop.eup %1521  ;;  %v564_v58 = vmul.f32 0.6931472, %v1520_v47  ;;  %1533 = vpow2.f32 %v676_v49  ;;  %v2217_v25 = vunpack.c.l.bf16 %v719_v6  ;;  %v2232_v49 = vunpack.c.h.bf16 %v719_v6 }
  0xc3   : > { %v1524_v62 = vpop.eup %1523  ;;  %v566_v63 = vmul.f32 0.6931472, %v1522_v57  ;;  %v569_v30 = vrot.slane %v562_v48, 4  ;;  %1535 = vpow2.f32 %v678_v59  ;;  %v720_v59 = vld [vmem:[%s2047_s14 + $0x20] sm:$0xff]  ;;  %vm1109_vm11 = vcmask 1042434  }
  0xc4   : > { %v1526_v4 = vpop.eup %1525  ;;  %v575_v5 = vrot.slane %v564_v58, 4  ;;  %v2205_v7 = vmul.f32 %v1524_v62, %v553_v17  ;;  %1537 = vpow2.f32 %v680_v60  ;;  %v2239_v6 = vunpack.c.h.bf16 %v720_v59 }
  0xc5   : > { %v1528_v10 = vpop.eup %1527  ;;  %v568_v11 = vmul.f32 0.6931472, %v1526_v4  ;;  %v570_v12 = vadd.f32 %v569_v30, %v562_v48  ;;  %v581_v3 = vrot.slane %v566_v63, 4  ;;  %1539 = vpow2.f32 %v682_v1 }
  0xc6   : > { %2780 = vst [vmem:[#allocation26_spill] sm:$0xff] %v2205_v7  ;;  %v1530_v14 = vpop.eup %1529  ;;  %v576_v15 = vadd.f32 %v575_v5, %v564_v58  ;;  %v2213_v16 = vmul.f32 %v1528_v10, %v554_v9  ;;  %v688_v50 = vrot.slane %v2205_v7, 4  ;;  %vm1094_vm1 = vcmask 1043456  }
  0xc7   : > { %v1532_v20 = vpop.eup %1531  ;;  %v571_v51 = vrot.slane %v570_v12, 2  ;;  %v582_v21 = vadd.f32 %v581_v3, %v566_v63  ;;  %v587_v22 = vrot.slane %v568_v11, 4  ;;  %v2222_v24 = vmul.f32 %v1530_v14, %v2181_v19 }
  0xc8   : > { %2781 = vst [vmem:[#allocation27_spill] sm:$0xff] %v2213_v16  ;;  %v577_v17 = vrot.slane %v576_v15, 2  ;;  %v689_v18 = vadd.f32 %v688_v50, %v2205_v7  ;;  %v694_v52 = vrot.slane %v2213_v16, 4  ;;  %v2225_v27 = vmul.f32 %v1532_v20, %v2188_v23  ;;  %v1534_v34 = vpop.eup %1533 }
  0xc9   : > { %v572_v53 = vadd.f32 %v571_v51, %v570_v12  ;;  %v583_v28 = vrot.slane %v582_v21, 2  ;;  %v588_v9 = vadd.f32 %v587_v22, %v568_v11  ;;  %2782 = vst [vmem:[#allocation28_spill] sm:$0xff] %v2222_v24  ;;  %v700_v23 = vrot.slane %v2222_v24, 4  ;;  %v1536_v40 = vpop.eup %1535  ;;  %v2246_v22 = vld [vmem:[%s2243_s8] sm:$0xff] }
  0xca   : > { %v578_v29 = vadd.f32 %v577_v17, %v576_v15  ;;  %2783 = vst [vmem:[#allocation29_spill] sm:$0xff] %v2225_v27  ;;  %v690_v31 = vrot.slane %v689_v18, 2  ;;  %v695_v32 = vadd.f32 %v694_v52, %v2213_v16  ;;  %v706_v45 = vrot.slane %v2225_v27, 4  ;;  %v1538_v60 = vpop.eup %1537  ;;  %v721_v15 = vld [vmem:[%s2047_s14 + $0x28] sm:$0xff] }
  0xcb   : > { %v573_v38 = vrot.slane %v572_v53, 1  ;;  %v584_v33 = vadd.f32 %v583_v28, %v582_v21  ;;  %v589_v39 = vrot.slane %v588_v9, 2  ;;  %v701_v48 = vadd.f32 %v700_v23, %v2222_v24  ;;  %v1540_v4 = vpop.eup %1539  ;;  %v2361_v23 = vld [vmem:[%s2243_s8 + $0xb0] sm:$0xff] }
  0xcc   : > { %v579_v35 = vrot.slane %v578_v29, 1  ;;  %v691_v37 = vadd.f32 %v690_v31, %v689_v18  ;;  %v696_v36 = vrot.slane %v695_v32, 2  ;;  %v684_v55 = vmax.f32 %v1534_v34, 1e-10  ;;  %v2258_v31 = vld [vmem:[%s2243_s8 + $0x10] sm:$0xff]  ;;  %2793 = vst [vmem:[#allocation39_spill] sm:$0xff] %v2361_v23 }
  0xcd   : > { %v574_v41 = vadd.f32 %v573_v38, %v572_v53  ;;  %v585_v19 = vrot.slane %v584_v33, 1  ;;  %v590_v26 = vadd.f32 %v589_v39, %v588_v9  ;;  %v707_v58 = vadd.f32 %v706_v45, %v2225_v27  ;;  %v2251_v53 = vld [vmem:[%s2243_s8 + $0x8] sm:$0xff]  ;;  %v2351_v45 = vld [vmem:[%s2243_s8 + $0xa0] sm:$0xff]  ;;  %v2368_v34 = vld [vmem:[%s2243_s8 + $0xb8] sm:$0xff] }
  0xce   : > { %v580_v42 = vadd.f32 %v579_v35, %v578_v29  ;;  %v692_v43 = vrot.slane %v691_v37, 1  ;;  %v697_v44 = vadd.f32 %v696_v36, %v695_v32  ;;  %v702_v1 = vrot.slane %v701_v48, 2  ;;  %v2261_v32 = vld [vmem:[%s2243_s8 + $0x18] sm:$0xff]  ;;  %v2267_v39 = vld [vmem:[%s2243_s8 + $0x28] sm:$0xff]  ;;  %v2272_v36 = vld [vmem:[%s2243_s8 + $0x30] sm:$0xff]  ;;  %2794 = vst [vmem:[#allocation40_spill] sm:$0xff] %v2368_v34 }
  0xcf   : > { %v586_v46 = vadd.f32 %v585_v19, %v584_v33  ;;  %v591_v47 = vrot.slane %v590_v26, 1  ;;  %v593_v54 = vmul.f32 1.442695, %v574_v41  ;;  %v685_v10 = vmax.f32 %v1536_v40, 1e-10  ;;  %v2264_v33 = vld [vmem:[%s2243_s8 + $0x20] sm:$0xff] }
  0xd0   : > { %v698_v57 = vrot.slane %v697_v44, 1  ;;  %v595_v63 = vmul.f32 1.442695, %v580_v42  ;;  %v693_v30 = vadd.f32 %v692_v43, %v691_v37  ;;  %v708_v12 = vrot.slane %v707_v58, 2  ;;  %v2275_v41 = vld [vmem:[%s2243_s8 + $0x38] sm:$0xff]  ;;  %v2281_v40 = vld [vmem:[%s2243_s8 + $0x40] sm:$0xff] }
  0xd1   : > { %v592_v62 = vadd.f32 %v591_v47, %v590_v26  ;;  %v597_v5 = vmul.f32 1.442695, %v586_v46  ;;  %v703_v14 = vadd.f32 %v702_v1, %v701_v48  ;;  %v2237_v50 = vunpack.c.l.bf16 %v720_v59  ;;  %v2290_v47 = vld [vmem:[%s2243_s8 + $0x48] sm:$0xff]  ;;  %v2293_v48 = vld [vmem:[%s2243_s8 + $0x50] sm:$0xff] }
  0xd2   : > { %v699_v11 = vadd.f32 %v698_v57, %v697_v44  ;;  %1541 = vpow2.f32 %v593_v54  ;;  %v686_v20 = vmax.f32 %v1538_v60, 1e-10  ;;  %v709_v51 = vadd.f32 %v708_v12, %v707_v58  ;;  %v2320_v12 = vld [vmem:[%s2243_s8 + $0x70] sm:$0xff]  ;;  %v2348_v54 = vld [vmem:[%s2243_s8 + $0x98] sm:$0xff] }
  0xd3   : > { %v599_v3 = vmul.f32 1.442695, %v592_v62  ;;  %v2241_v21 = vunpack.c.l.bf16 %v721_v15  ;;  %1543 = vpow2.f32 %v595_v63  ;;  %v687_v17 = vmax.f32 %v1540_v4, 1e-10  ;;  %v2304_v62 = vld [vmem:[%s2243_s8 + $0x58] sm:$0xff]  ;;  %v2307_v63 = vld [vmem:[%s2243_s8 + $0x60] sm:$0xff] }
  0xd4   : > { %v704_v18 = vrot.slane %v703_v14, 1  ;;  %v2248_v52 = vadd.f32 %v693_v30, %v684_v55  ;;  %1545 = vpow2.f32 %v597_v5  ;;  %v710_v28 = vrot.slane %v709_v51, 1 }
  0xd5   : > { %v2253_v9 = vadd.f32 %v699_v11, %v685_v10  ;;  %v2255_v29 = vunpack.c.h.bf16 %v721_v15  ;;  %1547 = vpow2.f32 %v599_v3  ;;  %v771_v30 = vunpack.c.h.bf16 %v2272_v36  ;;  %v2317_v11 = vld [vmem:[%s2243_s8 + $0x68] sm:$0xff] }
  0xd6   : > { %2784 = vst [vmem:[#allocation30_spill] sm:$0xff] %v2248_v52  ;;  %v705_v38 = vadd.f32 %v704_v18, %v703_v14  ;;  %v711_v37 = vadd.f32 %v710_v28, %v709_v51  ;;  %v772_v1 = vunpack.c.l.bf16 %v2275_v41  ;;  %v773_v4 = vunpack.c.h.bf16 %v2275_v41  ;;  %v2328_v51 = vld [vmem:[%s2243_s8 + $0x78] sm:$0xff]  ;;  %v2331_v18 = vld [vmem:[%s2243_s8 + $0x80] sm:$0xff]  ;;  %v2338_v41 = vld [vmem:[%s2243_s8 + $0x88] sm:$0xff] }
  0xd7   : > { %2785 = vst [vmem:[#allocation31_spill] sm:$0xff] %v2253_v9  ;;  %v774_v3 = vunpack.c.l.bf16 %v2281_v40  ;;  %v775_v14 = vunpack.c.h.bf16 %v2281_v40  ;;  %v776_v15 = vunpack.c.l.bf16 %v2290_v47  ;;  %v778_v28 = vunpack.c.l.bf16 %v2293_v48  ;;  %v2341_v40 = vld [vmem:[%s2243_s8 + $0x90] sm:$0xff] }
  0xd8   : > { %v2287_v46 = vpop.eup %1541  ;;  %v2301_v60 = vadd.f32 %v705_v38, %v686_v20  ;;  %v2314_v10 = vadd.f32 %v711_v37, %v687_v17  ;;  %v777_v17 = vunpack.c.h.bf16 %v2290_v47  ;;  %v779_v38 = vunpack.c.h.bf16 %v2293_v48 }
  0xd9   : > { %2786 = vst [vmem:[#allocation32_spill] sm:$0xff] %v2287_v46  ;;  %v2299_v59 = vpop.eup %1543  ;;  %v780_v37 = vunpack.c.l.bf16 %v2304_v62  ;;  %v781_v58 = vunpack.c.h.bf16 %v2304_v62  ;;  %v782_v57 = vunpack.c.l.bf16 %v2307_v63  ;;  %v783_v55 = vunpack.c.h.bf16 %v2307_v63  ;;  %v2358_v62 = vld [vmem:[%s2243_s8 + $0xa8] sm:$0xff] }
  0xda   : > { %2787 = vst [vmem:[#allocation33_spill] sm:$0xff] %v2299_v59  ;;  %v2312_v5 = vpop.eup %1545  ;;  %v784_v47 = vunpack.c.l.bf16 %v2317_v11  ;;  %v785_v48 = vunpack.c.h.bf16 %v2317_v11  ;;  %v786_v44 = vunpack.c.l.bf16 %v2320_v12  ;;  %v787_v43 = vunpack.c.h.bf16 %v2320_v12 }
  0xdb   : > { %2788 = vst [vmem:[#allocation34_spill] sm:$0xff] %v2301_v60  ;;  %v2325_v20 = vpop.eup %1547  ;;  %v788_v42 = vunpack.c.l.bf16 %v2328_v51  ;;  %v789_v63 = vunpack.c.h.bf16 %v2328_v51  ;;  %v790_v26 = vunpack.c.l.bf16 %v2331_v18  ;;  %v791_v19 = vunpack.c.h.bf16 %v2331_v18 }
  0xdc   : > { %2789 = vst [vmem:[#allocation35_spill] sm:$0xff] %v2312_v5  ;;  %v792_v35 = vunpack.c.l.bf16 %v2338_v41  ;;  %v793_v11 = vunpack.c.h.bf16 %v2338_v41  ;;  %v794_v12 = vunpack.c.l.bf16 %v2341_v40  ;;  %v796_v5 = vunpack.c.l.bf16 %v2348_v54 }
  0xdd   : > { %2790 = vst [vmem:[#allocation36_spill] sm:$0xff] %v2314_v10  ;;  %v797_v59 = vunpack.c.h.bf16 %v2348_v54  ;;  %v2795_v52 = vunpack.c.l.bf16 %v2246_v22  ;;  %v2796_v51 = vunpack.c.h.bf16 %v2246_v22  ;;  %v2797_v18 = vunpack.c.l.bf16 %v2251_v53 }
  0xde   : > { %2791 = vst [vmem:[#allocation37_spill] sm:$0xff] %v2325_v20  ;;  %v795_v20 = vunpack.c.h.bf16 %v2341_v40  ;;  %v2798_v60 = vunpack.c.h.bf16 %v2251_v53  ;;  %v2799_v9 = vunpack.c.l.bf16 %v2258_v31  ;;  %v2800_v27 = vunpack.c.h.bf16 %v2258_v31 }
  0xdf   : > { %2792 = vst [vmem:[#allocation38_spill] sm:$0xff] %v2358_v62  ;;  %v806_v54 = vmul.f32 %v2795_v52, %v2199_v56  ;;  %v807_v46 = vmul.f32 %v2796_v51, %v2201_v61  ;;  %v808_v10 = vmul.f32 %v2797_v18, %v2203_v2  ;;  %v2801_v22 = vunpack.c.l.bf16 %v2261_v32 }
  0xe0   : > { %v809_v41 = vmul.f32 %v2798_v60, %v2207_v0  ;;  %v810_v40 = vmul.f32 %v2799_v9, %v2199_v56  ;;  %v811_v52 = vmul.f32 %v2800_v27, %v2201_v61  ;;  %v2802_v24 = vunpack.c.h.bf16 %v2261_v32 }
  0xe1   : > { %v812_v51 = vmul.f32 %v2801_v22, %v2203_v2  ;;  %v2803_v53 = vunpack.c.l.bf16 %v2264_v33  ;;  %v2804_v16 = vunpack.c.h.bf16 %v2264_v33  ;;  %v2805_v31 = vunpack.c.l.bf16 %v2267_v39 }
  0xe2   : > { %v813_v18 = vmul.f32 %v2802_v24, %v2207_v0  ;;  %v2806_v7 = vunpack.c.h.bf16 %v2267_v39  ;;  %v2807_v32 = vunpack.c.l.bf16 %v2272_v36  ;;  %v819_v34 = vmul.f32 %v771_v30, %v2201_v61 }
  0xe3   : > { %v814_v60 = vmul.f32 %v2803_v53, %v2199_v56  ;;  %v815_v9 = vmul.f32 %v2804_v16, %v2201_v61  ;;  %v816_v27 = vmul.f32 %v2805_v31, %v2203_v2  ;;  %v820_v53 = vmul.f32 %v772_v1, %v2203_v2 }
  0xe4   : > { %v817_v22 = vmul.f32 %v2806_v7, %v2207_v0  ;;  %v818_v24 = vmul.f32 %v2807_v32, %v2199_v56  ;;  %v821_v23 = vmul.f32 %v773_v4, %v2207_v0  ;;  %v822_v16 = vmul.f32 %v774_v3, %v2209_v8  ;;  %v2813_v32 = vld [vmem:[#allocation39_spill] sm:$0xff] }
  0xe5   : > { %v823_v33 = vmul.f32 %v775_v14, %v2211_v13  ;;  %v824_v31 = vmul.f32 %v776_v15, %v2217_v25  ;;  %v825_v62 = vmul.f32 %v777_v17, %v2232_v49  ;;  %v826_v7 = vmul.f32 %v778_v28, %v2209_v8 }
  0xe6   : > { %v827_v39 = vmul.f32 %v779_v38, %v2211_v13  ;;  %v828_v56 = vmul.f32 %v780_v37, %v2217_v25  ;;  %v829_v61 = vmul.f32 %v781_v58, %v2232_v49  ;;  %v830_v2 = vmul.f32 %v782_v57, %v2209_v8 }
  0xe7   : > { %v831_v0 = vmul.f32 %v783_v55, %v2211_v13  ;;  %v832_v36 = vmul.f32 %v784_v47, %v2217_v25  ;;  %v833_v30 = vmul.f32 %v785_v48, %v2232_v49  ;;  %v834_v1 = vmul.f32 %v786_v44, %v2209_v8 }
  0xe8   : > { %v835_v4 = vmul.f32 %v787_v43, %v2211_v13  ;;  %v836_v3 = vmul.f32 %v788_v42, %v2217_v25  ;;  %v837_v14 = vmul.f32 %v789_v63, %v2232_v49  ;;  %v838_v15 = vadd.f32 %v822_v16, %v806_v54 }
  0xe9   : > { %v839_v17 = vadd.f32 %v823_v33, %v807_v46  ;;  %v840_v28 = vadd.f32 %v824_v31, %v808_v10  ;;  %v841_v58 = vadd.f32 %v825_v62, %v809_v41  ;;  %v842_v38 = vadd.f32 %v826_v7, %v810_v40 }
  0xea   : > { %v843_v57 = vadd.f32 %v827_v39, %v811_v52  ;;  %v844_v37 = vadd.f32 %v828_v56, %v812_v51  ;;  %v845_v55 = vadd.f32 %v829_v61, %v813_v18  ;;  %v854_v47 = vmul.f32 %v790_v26, %v2237_v50  ;;  %v2819_v61 = vld [vmem:[#allocation26_spill] sm:$0xff] }
  0xeb   : > { %v855_v48 = vmul.f32 %v791_v19, %v2239_v6  ;;  %v856_v8 = vmul.f32 %v792_v35, %v2241_v21  ;;  %v857_v13 = vmul.f32 %v793_v11, %v2255_v29  ;;  %v858_v25 = vmul.f32 %v794_v12, %v2237_v50 }
  0xec   : > { %v859_v49 = vmul.f32 %v795_v20, %v2239_v6  ;;  %v860_v42 = vmul.f32 %v796_v5, %v2241_v21  ;;  %v846_v43 = vadd.f32 %v830_v2, %v814_v60  ;;  %v847_v44 = vadd.f32 %v831_v0, %v815_v9  ;;  %v2810_v60 = vld [vmem:[#allocation38_spill] sm:$0xff]  ;;  %v2820_v0 = vld [vmem:[#allocation27_spill] sm:$0xff] }
  0xed   : > { %v848_v46 = vadd.f32 %v832_v36, %v816_v27  ;;  %v861_v10 = vmul.f32 %v797_v59, %v2255_v29  ;;  %v849_v62 = vadd.f32 %v833_v30, %v817_v22  ;;  %v850_v63 = vadd.f32 %v834_v1, %v818_v24  ;;  %v2821_v30 = vld [vmem:[#allocation28_spill] sm:$0xff] }
  0xee   : > { %v851_v26 = vadd.f32 %v835_v4, %v819_v34  ;;  %v852_v41 = vadd.f32 %v836_v3, %v820_v53  ;;  %v853_v19 = vadd.f32 %v837_v14, %v821_v23  ;;  %v870_v40 = vadd.f32 %v854_v47, %v838_v15  ;;  %v2822_v4 = vld [vmem:[#allocation29_spill] sm:$0xff] }
  0xef   : > { %v871_v35 = vadd.f32 %v855_v48, %v839_v17  ;;  %v872_v54 = vadd.f32 %v856_v8, %v840_v28  ;;  %v873_v11 = vadd.f32 %v857_v13, %v841_v58  ;;  %v874_v52 = vadd.f32 %v858_v25, %v842_v38 }
  0xf0   : > { %v875_v12 = vadd.f32 %v859_v49, %v843_v57  ;;  %v876_v51 = vadd.f32 %v860_v42, %v844_v37  ;;  %v2808_v5 = vunpack.c.l.bf16 %v2351_v45  ;;  %v2809_v18 = vunpack.c.h.bf16 %v2351_v45  ;;  %v2816_v45 = vld [vmem:[#allocation40_spill] sm:$0xff] }
  0xf1   : > { %v2811_v34 = vunpack.c.l.bf16 %v2810_v60  ;;  %v877_v23 = vadd.f32 %v861_v10, %v845_v55  ;;  %v2812_v27 = vunpack.c.h.bf16 %v2810_v60  ;;  %v2814_v24 = vunpack.c.l.bf16 %v2813_v32 }
  0xf2   : > { %v862_v20 = vmul.f32 %v2808_v5, %v2237_v50  ;;  %v863_v59 = vmul.f32 %v2809_v18, %v2239_v6  ;;  %v2815_v16 = vunpack.c.h.bf16 %v2813_v32  ;;  %v2817_v31 = vunpack.c.l.bf16 %v2816_v45 }
  0xf3   : > { %v864_v9 = vmul.f32 %v2811_v34, %v2241_v21  ;;  %v865_v22 = vmul.f32 %v2812_v27, %v2255_v29  ;;  %v866_v53 = vmul.f32 %v2814_v24, %v2237_v50  ;;  %v2818_v39 = vunpack.c.h.bf16 %v2816_v45 }
  0xf4   : > { %v867_v33 = vmul.f32 %v2815_v16, %v2239_v6  ;;  %v868_v7 = vmul.f32 %v2817_v31, %v2241_v21  ;;  %v886_v2 = vmul.f32 %v870_v40, %v2819_v61  ;;  %v887_v36 = vmul.f32 %v871_v35, %v2820_v0 }
  0xf5   : > { %v869_v56 = vmul.f32 %v2818_v39, %v2255_v29  ;;  %v888_v1 = vmul.f32 %v872_v54, %v2821_v30  ;;  %v889_v50 = vmul.f32 %v873_v11, %v2822_v4  ;;  %v890_v3 = vmul.f32 %v874_v52, %v2819_v61 }
  0xf6   : > { %v891_v6 = vmul.f32 %v875_v12, %v2820_v0  ;;  %v892_v14 = vmul.f32 %v876_v51, %v2821_v30  ;;  %v878_v15 = vadd.f32 %v862_v20, %v846_v43  ;;  %v879_v21 = vadd.f32 %v863_v59, %v847_v44 }
  0xf7   : > { %v880_v17 = vadd.f32 %v864_v9, %v848_v46  ;;  %v893_v28 = vmul.f32 %v877_v23, %v2822_v4  ;;  %v881_v29 = vadd.f32 %v865_v22, %v849_v62  ;;  %v882_v58 = vadd.f32 %v866_v53, %v850_v63 }
  0xf8   : > { %v883_v38 = vadd.f32 %v867_v33, %v851_v26  ;;  %v884_v57 = vadd.f32 %v868_v7, %v852_v41  ;;  %v885_v37 = vadd.f32 %v869_v56, %v853_v19  ;;  %v902_v55 = vrot.slane %v886_v2, 4 }
  0xf9   : > { %v908_v47 = vrot.slane %v887_v36, 4  ;;  %v914_v48 = vrot.slane %v888_v1, 4  ;;  %v920_v8 = vrot.slane %v889_v50, 4  ;;  %v926_v13 = vrot.slane %v890_v3, 4 }
  0xfa   : > { %v932_v25 = vrot.slane %v891_v6, 4  ;;  %v938_v49 = vrot.slane %v892_v14, 4  ;;  %v903_v42 = vadd.f32 %v902_v55, %v886_v2  ;;  %v944_v43 = vrot.slane %v893_v28, 4 }
  0xfb   : > { %v909_v10 = vadd.f32 %v908_v47, %v887_v36  ;;  %v915_v40 = vadd.f32 %v914_v48, %v888_v1  ;;  %v921_v44 = vadd.f32 %v920_v8, %v889_v50  ;;  %v927_v46 = vadd.f32 %v926_v13, %v890_v3 }
  0xfc   : > { %v933_v35 = vadd.f32 %v932_v25, %v891_v6  ;;  %v939_v54 = vadd.f32 %v938_v49, %v892_v14  ;;  %v904_v62 = vrot.slane %v903_v42, 2  ;;  %v945_v41 = vadd.f32 %v944_v43, %v893_v28 }
  0xfd   : > { %v910_v63 = vrot.slane %v909_v10, 2  ;;  %v916_v26 = vrot.slane %v915_v40, 2  ;;  %v922_v19 = vrot.slane %v921_v44, 2  ;;  %v928_v11 = vrot.slane %v927_v46, 2 }
  0xfe   : > { %v934_v52 = vrot.slane %v933_v35, 2  ;;  %v940_v12 = vrot.slane %v939_v54, 2  ;;  %v905_v51 = vadd.f32 %v904_v62, %v903_v42  ;;  %v946_v18 = vrot.slane %v945_v41, 2 }
  0xff   : > { %v911_v5 = vadd.f32 %v910_v63, %v909_v10  ;;  %v917_v20 = vadd.f32 %v916_v26, %v915_v40  ;;  %v923_v59 = vadd.f32 %v922_v19, %v921_v44  ;;  %v929_v60 = vadd.f32 %v928_v11, %v927_v46 }
 0x100   : > { %v935_v34 = vadd.f32 %v934_v52, %v933_v35  ;;  %v941_v9 = vadd.f32 %v940_v12, %v939_v54  ;;  %v894_v23 = vmul.f32 %v878_v15, %v2819_v61  ;;  %v895_v27 = vmul.f32 %v879_v21, %v2820_v0 }
 0x101   : > { %v896_v22 = vmul.f32 %v880_v17, %v2821_v30  ;;  %v947_v32 = vadd.f32 %v946_v18, %v945_v41  ;;  %v897_v24 = vmul.f32 %v881_v29, %v2822_v4  ;;  %v898_v53 = vmul.f32 %v882_v58, %v2819_v61 }
 0x102   : > { %v899_v16 = vmul.f32 %v883_v38, %v2820_v0  ;;  %v900_v33 = vmul.f32 %v884_v57, %v2821_v30  ;;  %v901_v45 = vmul.f32 %v885_v37, %v2822_v4  ;;  %v906_v31 = vrot.slane %v905_v51, 1 }
 0x103   : > { %v912_v7 = vrot.slane %v911_v5, 1  ;;  %v918_v39 = vrot.slane %v917_v20, 1  ;;  %v924_v56 = vrot.slane %v923_v59, 1  ;;  %v930_v2 = vrot.slane %v929_v60, 1 }
 0x104   : > { %v936_v36 = vrot.slane %v935_v34, 1  ;;  %v942_v1 = vrot.slane %v941_v9, 1  ;;  %v948_v50 = vrot.slane %v947_v32, 1  ;;  %v950_v3 = vrot.slane %v894_v23, 4 }
 0x105   : > { %v956_v6 = vrot.slane %v895_v27, 4  ;;  %v962_v14 = vrot.slane %v896_v22, 4  ;;  %v968_v15 = vrot.slane %v897_v24, 4  ;;  %v974_v21 = vrot.slane %v898_v53, 4 }
 0x106   : > { %v980_v61 = vrot.slane %v899_v16, 4  ;;  %v986_v17 = vrot.slane %v900_v33, 4  ;;  %v951_v0 = vadd.f32 %v950_v3, %v894_v23  ;;  %v992_v29 = vrot.slane %v901_v45, 4 }
 0x107   : > { %v957_v28 = vadd.f32 %v956_v6, %v895_v27  ;;  %v963_v30 = vadd.f32 %v962_v14, %v896_v22  ;;  %v969_v4 = vadd.f32 %v968_v15, %v897_v24  ;;  %v975_v58 = vadd.f32 %v974_v21, %v898_v53  ;;  %v2826_v6 = vld [vmem:[#allocation36_spill] sm:$0xff] }
 0x108   : > { %v981_v38 = vadd.f32 %v980_v61, %v899_v16  ;;  %v987_v57 = vadd.f32 %v986_v17, %v900_v33  ;;  %v952_v37 = vrot.slane %v951_v0, 2  ;;  %v993_v48 = vadd.f32 %v992_v29, %v901_v45  ;;  %v2823_v45 = vld [vmem:[#allocation30_spill] sm:$0xff] }
 0x109   : > { %v958_v55 = vrot.slane %v957_v28, 2  ;;  %v964_v47 = vrot.slane %v963_v30, 2  ;;  %v970_v8 = vrot.slane %v969_v4, 2  ;;  %v976_v13 = vrot.slane %v975_v58, 2 }
 0x10a   : > { %v982_v25 = vrot.slane %v981_v38, 2  ;;  %v988_v49 = vrot.slane %v987_v57, 2  ;;  %v953_v42 = vadd.f32 %v952_v37, %v951_v0  ;;  %v994_v43 = vrot.slane %v993_v48, 2 }
 0x10b   : > { %v959_v10 = vadd.f32 %v958_v55, %v957_v28  ;;  %v965_v40 = vadd.f32 %v964_v47, %v963_v30  ;;  %v971_v44 = vadd.f32 %v970_v8, %v969_v4  ;;  %v977_v46 = vadd.f32 %v976_v13, %v975_v58 }
 0x10c   : > { %v983_v35 = vadd.f32 %v982_v25, %v981_v38  ;;  %v989_v54 = vadd.f32 %v988_v49, %v987_v57  ;;  %v2489_v62 = vadd.f32 %v906_v31, %v905_v51  ;;  %v954_v63 = vrot.slane %v953_v42, 1  ;;  %v2836_v49 = vld [vmem:[#allocation33_spill] sm:$0xff] }
 0x10d   : > { %v960_v26 = vrot.slane %v959_v10, 1  ;;  %v995_v41 = vadd.f32 %v994_v43, %v993_v48  ;;  %v2491_v19 = vadd.f32 %v912_v7, %v911_v5  ;;  %v2493_v11 = vadd.f32 %v918_v39, %v917_v20  ;;  %v2825_v39 = vld [vmem:[#allocation34_spill] sm:$0xff]  ;;  %v2835_v48 = vld [vmem:[#allocation32_spill] sm:$0xff]  ;;  %v2838_v43 = vld [vmem:[#allocation37_spill] sm:$0xff] }
 0x10e   : > { %v966_v52 = vrot.slane %v965_v40, 1  ;;  %v972_v12 = vrot.slane %v971_v44, 1  ;;  %v2495_v18 = vadd.f32 %v924_v56, %v923_v59  ;;  %v2497_v23 = vadd.f32 %v930_v2, %v929_v60 }
 0x10f   : > { %v2499_v27 = vadd.f32 %v936_v36, %v935_v34  ;;  %v2501_v22 = vadd.f32 %v942_v1, %v941_v9  ;;  %v2503_v24 = vadd.f32 %v948_v50, %v947_v32  ;;  %v978_v51 = vrot.slane %v977_v46, 1  ;;  %v2824_v9 = vld [vmem:[#allocation31_spill] sm:$0xff] }
 0x110   : > { %v984_v53 = vrot.slane %v983_v35, 1  ;;  %v990_v16 = vrot.slane %v989_v54, 1  ;;  %v2505_v33 = vadd.f32 %v954_v63, %v953_v42  ;;  %v2507_v5 = vadd.f32 %v960_v26, %v959_v10  ;;  %v2837_v10 = vld [vmem:[#allocation35_spill] sm:$0xff] }
 0x111   : > { %v996_v20 = vrot.slane %v995_v41, 1  ;;  %1549 = vrcp.f32 %v2823_v45  ;;  %v2510_v59 = vadd.f32 %v966_v52, %v965_v40  ;;  %v2512_v60 = vadd.f32 %v972_v12, %v971_v44 }
 0x112   : > { %v1007_v34 = vand.u32 2147483647, %v2823_v45  ;;  %1551 = vrcp.f32 %v2824_v9  ;;  %v1009_v32 = vand.u32 2147483648, %v2823_v45  ;;  %v1022_v31 = vand.u32 2147483647, %v2824_v9 }
 0x113   : > { %v1024_v7 = vand.u32 2147483648, %v2824_v9  ;;  %1553 = vrcp.f32 %v2825_v39  ;;  %v2520_v56 = vadd.f32 %v978_v51, %v977_v46  ;;  %v2522_v2 = vadd.f32 %v984_v53, %v983_v35 }
 0x114   : > { %v1037_v36 = vand.u32 2147483647, %v2825_v39  ;;  %v1039_v1 = vand.u32 2147483648, %v2825_v39  ;;  %v2526_v50 = vadd.f32 %v990_v16, %v989_v54  ;;  %v2528_v3 = vadd.f32 %v996_v20, %v995_v41 }
 0x115   : > { %vm1003_vm2 = vweird.f32 %v2823_v45  ;;  %1555 = vrcp.f32 %v2826_v6  ;;  %vm2532_vm3 = vcmp.eq.f32.partialorder %v1007_v34, 8.507059e+37  ;;  %vm1018_vm4 = vweird.f32 %v2824_v9 }
 0x116   : > { %vm1033_vm5 = vweird.f32 %v2825_v39  ;;  %v1052_v15 = vand.u32 2147483647, %v2826_v6  ;;  %v1010_v61 = vor.u32 1.1754944e-38, %v1009_v32  ;;  %vm2539_vm6 = vcmp.eq.f32.partialorder %v1022_v31, 8.507059e+37 }
 0x117   : > { %v1550_v21 = vpop.eup %1549  ;;  %v1025_v0 = vor.u32 1.1754944e-38, %v1024_v7  ;;  %vm2545_vm8 = vcmp.eq.f32.partialorder %v1037_v36, 8.507059e+37  ;;  %v1040_v4 = vor.u32 1.1754944e-38, %v1039_v1  ;;  %v1054_v58 = vand.u32 2147483648, %v2826_v6 }
 0x118   : > { %v1552_v28 = vpop.eup %1551  ;;  %v999_v30 = vmul.f32 %v1550_v21, %v2823_v45  ;;  %vm1004_vm9 = vweird.f32 %v1550_v21  ;;  %vm2552_vm13 = vcmp.eq.f32.partialorder %v1052_v15, 8.507059e+37  ;;  %v1131_v8 = vsub.f32 1.0, %v2835_v48 }
 0x119   : > { %v1554_v38 = vpop.eup %1553  ;;  %v1014_v57 = vmul.f32 %v1552_v28, %v2824_v9  ;;  %vm1019_vm10 = vweird.f32 %v1552_v28  ;;  %v1132_v42 = vsub.f32 1.0, %v2836_v49  ;;  %v1133_v40 = vsub.f32 1.0, %v2837_v10  ;;  %vm2564_vm15 = vmor %vm1003_vm2, %vm1004_vm9 }
 0x11a   : > { %v1000_v37 = vsub.f32 1.0, %v999_v30  ;;  %v1029_v55 = vmul.f32 %v1554_v38, %v2825_v39  ;;  %vm1034_vm12 = vweird.f32 %v1554_v38  ;;  %v1134_v44 = vsub.f32 1.0, %v2838_v43  ;;  %vm2571_vm0 = vmor %vm1018_vm4, %vm1019_vm10 }
 0x11b   : > { %v1556_v13 = vpop.eup %1555  ;;  %v1015_v25 = vsub.f32 1.0, %v1014_v57  ;;  %v1139_v41 = vrot.slane %v1132_v42, 7  ;;  %v1140_v52 = vrot.slane %v1133_v40, 6  ;;  %vm1142_vm7 = vcmask 1040384   ;;  %vm2578_vm2 = vmor %vm1033_vm5, %vm1034_vm12 }
 0x11c   : > { %v1001_v46 = vmul.f32 %v1550_v21, %v1000_v37  ;;  %v1030_v35 = vsub.f32 1.0, %v1029_v55  ;;  %v1044_v54 = vmul.f32 %v1556_v13, %v2826_v6  ;;  %vm1049_vm14 = vweird.f32 %v1556_v13 }
 0x11d   : > { %v1016_v26 = vmul.f32 %v1552_v28, %v1015_v25  ;;  %v1141_v12 = vrot.slane %v1134_v44, 5  ;;  %v1143_v32 = vsel %vm1142_vm7, %v1131_v8, %v1139_v41  ;;  %vm1145_vm4 = vcmask 1041408  }
 0x11e   : > { %v1002_v51 = vadd.f32 %v1550_v21, %v1001_v46  ;;  %v1031_v16 = vmul.f32 %v1554_v38, %v1030_v35  ;;  %v1045_v20 = vsub.f32 1.0, %v1044_v54  ;;  %v1055_v1 = vor.u32 1.1754944e-38, %v1054_v58 }
 0x11f   : > { %v1017_v45 = vadd.f32 %v1552_v28, %v1016_v26  ;;  %v1144_v31 = vsel %vm1109_vm11, %v1140_v52, %v1141_v12  ;;  %vm2845_vm5 = vweird.f32 %v2826_v6  ;;  %vm1106_vm9 = vcmask 1045509  }
 0x120   : > { %v1006_v9 = vsel %vm2564_vm15, %v1550_v21, %v1002_v51  ;;  %v1032_v7 = vadd.f32 %v1554_v38, %v1031_v16  ;;  %v1046_v36 = vmul.f32 %v1556_v13, %v1045_v20  ;;  %vm2592_vm7 = vmor %vm2845_vm5, %vm1049_vm14  ;;  %v2596_v57 = vsel %vm1145_vm4, %v1143_v32, %v1144_v31 }
 0x121   : > { %v1011_v15 = vsel %vm2532_vm3, %v1010_v61, %v1006_v9  ;;  %v1021_v39 = vsel %vm2571_vm0, %v1552_v28, %v1017_v45  ;;  %v1148_v21 = vlaneseq  ;;  %vm1104_vm3 = vcmask 1041409  }
 0x122   : > { %v1012_v37 = vmul.f32 %v1011_v15, %v2489_v62  ;;  %v1026_v14 = vsel %vm2539_vm6, %v1025_v0, %v1021_v39  ;;  %v1036_v61 = vsel %vm2578_vm2, %v1554_v38, %v1032_v7  ;;  %v1047_v58 = vadd.f32 %v1556_v13, %v1046_v36 }
 0x123   : > { %v1027_v6 = vmul.f32 %v1026_v14, %v2491_v19  ;;  %v1041_v28 = vsel %vm2545_vm8, %v1040_v4, %v1036_v61  ;;  %v1058_v55 = vmul.f32 %v1011_v15, %v2497_v23  ;;  %v1059_v48 = vmul.f32 %v1026_v14, %v2499_v27 }
 0x124   : > { %v1042_v62 = vmul.f32 %v1041_v28, %v2493_v11  ;;  %v1051_v17 = vsel %vm2592_vm7, %v1556_v13, %v1047_v58  ;;  %v1060_v0 = vmul.f32 %v1041_v28, %v2501_v22  ;;  %v1062_v38 = vmul.f32 %v1011_v15, %v2505_v33 }
 0x125   : > { %v1056_v19 = vsel %vm2552_vm13, %v1055_v1, %v1051_v17  ;;  %v1063_v29 = vmul.f32 %v1026_v14, %v2507_v5  ;;  %v1064_v23 = vmul.f32 %v1041_v28, %v2510_v59  ;;  %v1066_v27 = vmul.f32 %v1011_v15, %v2520_v56 }
 0x126   : > { %v1057_v4 = vmul.f32 %v1056_v19, %v2495_v18  ;;  %v1061_v11 = vmul.f32 %v1056_v19, %v2503_v24  ;;  %v1065_v8 = vmul.f32 %v1056_v19, %v2512_v60  ;;  %v1067_v22 = vmul.f32 %v1026_v14, %v2522_v2 }
 0x127   : > { %v1068_v33 = vmul.f32 %v1041_v28, %v2526_v50  ;;  %v1069_v5 = vmul.f32 %v1056_v19, %v2528_v3  ;;  %v1086_v59 = vrot.slane %v1027_v6, 4  ;;  %v1088_v56 = vrot.slane %v1059_v48, 4 }
 0x128   : > { %v1087_v18 = vrot.slane %v1057_v4, 4  ;;  %v1089_v47 = vrot.slane %v1061_v11, 4  ;;  %v1090_v24 = vrot.slane %v1063_v29, 4  ;;  %v1091_v13 = vrot.slane %v1065_v8, 4 }
 0x129   : > { %v1092_v60 = vrot.slane %v1067_v22, 4  ;;  %v1093_v25 = vrot.slane %v1069_v5, 4  ;;  %v1095_v2 = vsel %vm1094_vm1, %v1012_v37, %v1086_v59  ;;  %v1097_v49 = vsel %vm1094_vm1, %v1058_v55, %v1088_v56 }
 0x12a   : > { %v1096_v50 = vsel %vm1094_vm1, %v1042_v62, %v1087_v18  ;;  %v1098_v3 = vsel %vm1094_vm1, %v1060_v0, %v1089_v47  ;;  %v1099_v42 = vsel %vm1094_vm1, %v1062_v38, %v1090_v24  ;;  %v1100_v10 = vsel %vm1094_vm1, %v1064_v23, %v1091_v13 }
 0x12b   : > { %v1101_v40 = vsel %vm1094_vm1, %v1066_v27, %v1092_v60  ;;  %v1102_v43 = vsel %vm1094_vm1, %v1068_v33, %v1093_v25  ;;  %v1103_v44 = vrot.slane %v1097_v49, 7  ;;  %v1108_v46 = vrot.slane %v1099_v42, 6 }
 0x12c   : > { %v1118_v35 = vrot.slane %v1098_v3, 7  ;;  %v1121_v54 = vrot.slane %v1100_v10, 6  ;;  %vm1111_vm6 = vcmask 1046534   ;;  %v1113_v26 = vrot.slane %v1101_v40, 5 }
 0x12d   : > { %v1105_v63 = vsel %vm1104_vm3, %v1103_v44, %v1095_v2  ;;  %vm1150_vm8 = vcmp.lt.s32.totalorder %v1148_v21, 512  ;;  %vm1114_vm10 = vcmask 1043459   ;;  %v1124_v12 = vrot.slane %v1102_v43, 5 }
 0x12e   : > { %v1107_v41 = vsel %vm1106_vm9, %v1103_v44, %v1105_v63  ;;  %v1119_v52 = vsel %vm1104_vm3, %v1118_v35, %v1096_v50  ;;  %1152 = vst.msk [vmem:[%s438_s26] sm:$0xf] %vm1150_vm8, %v2596_v57  ;;  %vm1116_vm12 = vcmask 1047559  }
 0x12f   : > { %v1110_v51 = vsel %vm1109_vm11, %v1108_v46, %v1107_v41  ;;  %v1120_v53 = vsel %vm1106_vm9, %v1118_v35, %v1119_v52 }
 0x130   : > { %1734 = shalt.err (!%p1731_p5)
}
 0x131   : > { %1432 = dma.vmem_to_hbm [thread:$0]  (%p1901_p11), %s2648_s17, 64, %s2650_s18, %s1159_s19   ;;  %v1112_v16 = vsel %vm1111_vm6, %v1108_v46, %v1110_v51  ;;  %v1122_v20 = vsel %vm1109_vm11, %v1121_v54, %v1120_v53 }
 0x132   : > { %v1115_v45 = vsel %vm1114_vm10, %v1113_v26, %v1112_v16  ;;  %v1123_v34 = vsel %vm1111_vm6, %v1121_v54, %v1122_v20  ;;  %s1154_s28 = scalar_lea.sflag [#allocation4], %s2028_s30  ;;  %s1749_s21 = sshra.s32 %s1175_s20, 4  ;;  %s1750_s21 = int_to_ptr.hbm [resolvable:$true] %s1749_s21 }
 0x133   : > { %v1117_v32 = vsel %vm1116_vm12, %v1113_v26, %v1115_v45  ;;  %v1125_v31 = vsel %vm1114_vm10, %v1124_v12, %v1123_v34  ;;  %s1751_s24 = scalar_lea.hbm %s1750_s21, 16  ;;  %s1755_s10 = scalar_lea.hbm %s2715_s5, 32 }
 0x134   : > { %v1126_v9 = vsel %vm1116_vm12, %v1124_v12, %v1125_v31  ;;  %1129 = vst [vmem:[%s431_s11] sm:$0xff] %v1117_v32  ;;  %p1752_p7 = scmp.ne.s32.totalorder %s1750_s21, %s1751_s24  ;;  %p1756_p0 = scmp.lt.s32.totalorder %s1750_s21, %s2715_s5 }
 0x135   : > { %1130 = vst [vmem:[%s431_s11 + $0x8] sm:$0xff] %v1126_v9  ;;  %p1757_p6 = scmp.lt.s32.totalorder %s1755_s10, %s1751_s24 }
 0x136   : > { %p1753_p8 = pnand %p1752_p7, %p1901_p11 }
 0x137   : > { %p1758_p13 = por %p1757_p6, %p1756_p0 }
 0x138   : > { %p1754_p10 = pneg %p1753_p8 }
 0x13a   : > { %p1759_p1 = pnand %p1758_p13, %p1754_p10 }
 0x13c   : > { %1762 = shalt.err (!%p1759_p1)
}
 0x13d   : > { %1431 = dma.vmem_to_hbm [thread:$0]  (%p1901_p11), %s1173_s29, 256, %s1175_s20, %s1154_s28  }
 0x13e PF: > { %s2849_s30 = sld [smem:[#allocation19_spill]]  ;;  %p1452_p2 = pnand %p1380_p9, %p1905_p12 }
 0x140   : > { %p1453_p3 = pneg %p1452_p2 }
 0x144   : > { %s1200_s12 = sand.u32 1, %s2849_s30  }
 0x145   : > { %s1201_s15 = scalar_lea.sflag [#allocation4], %s1200_s12 }
 0x146   : > { %1792 = dma.done.wait (%p1453_p3), %s1201_s15, 256  }
 0x147   : > { %1794 = vsyncadd (%p1453_p3), %s1201_s15, 4294967040  ;;  %s1211_s11 = scalar_lea.sflag [#allocation13], %s1200_s12 }
 0x148   : > { %1796 = dma.done.wait (%p1453_p3), %s1211_s11, 64  }
 0x149   : > { %1798 = vsyncadd (%p1453_p3), %s1211_s11, 4294967232  ;;  %s2852_s24 = sld [smem:[#allocation22_spill]]  ;;  %s2855_s21 = smov %s1805_s22 }
 0x14a   : > { %s2853_s19 = sld [smem:[#allocation20_spill]] }
 0x14b   : > { %s2854_s23 = sld [smem:[#allocation23_spill]] }
 0x14f   : > { %p29_p11 = scmp.ge.s32.totalorder %s2852_s24, 4  }
 0x150   : > { %s2856_s22 = smov %s2853_s19 }
 0x151   :  { %31 = sbr.rel (!%p29_p11) target bundleno = 14 (0xe), region = 150 }
 0x156   :  { %1217 = vsyncpa [#allocation3], 1 }
 0x157   :  { %1219 = vsyncpa [#allocation3 + $0x1], 1 }
 0x158   :  { %1220 = vsyncpa [#allocation6], 1 }
 0x159   :  { %1222 = vsyncpa [#allocation6 + $0x1], 1 }
 0x15a   :  { %1223 = vsyncpa [#allocation9], 1 }
 0x15b   :  { %1225 = vsyncpa [#allocation9 + $0x1], 1 }
 0x15c   :  { %1226 = vsyncpa [#allocation4], 1 }
 0x15d   :  { %1228 = vsyncpa [#allocation4 + $0x1], 1 }
 0x15e   :  { %1229 = vsyncpa [#allocation13], 1 }
 0x15f   :  { %1231 = vsyncpa [#allocation13 + $0x1], 1 }

</bundles_post_ra>
